<compile_context>
chip_gen: v7x
topology: tpu7x:2x2x1
jax: 0.10.0
libtpu: 0.0.40
codegen_flags: <defaults>
</compile_context>

<pallas_src>
import math

import jax
import jax.numpy as jnp
from jax import lax
from jax.experimental import pallas as pl
from jax.experimental.pallas import tpu as pltpu  # noqa: F401  (VMEM spaces if streaming lands)

HIDDEN = 32
NUM_HEADS = 2
HEAD_DIM = HIDDEN // NUM_HEADS
INTERMEDIATE = 64
NUM_LAYERS = 2
VOCAB = 64
MAX_POS = 16
LN_EPS = 1e-12
NEG_INF = -1e9


# ------------------------------------------------------------ in-kernel math --

def _layer_norm(x, gamma, beta, eps=LN_EPS):
    mean = jnp.mean(x, axis=-1, keepdims=True)
    cen = x - mean
    var = jnp.mean(cen * cen, axis=-1, keepdims=True)
    return cen * lax.rsqrt(var + eps) * gamma + beta


def _gelu(x):
    # tanh-approx GELU (EUP tanh).  HF BERT default is erf-based GELU; the
    # difference is ~1e-3 relative and erf has no guaranteed Mosaic lowering.
    c = math.sqrt(2.0 / math.pi)
    return 0.5 * x * (1.0 + jnp.tanh(c * (x + 0.044715 * x * x * x)))


# ------------------------------------------------------- fused forward kernel --

def _fused_bert_kernel(ids_ref, word_ref, pos_ref, type_ref,
                       emb_g_ref, emb_b_ref,
                       wqkv_ref, bqkv_ref, wo_ref, bo_ref,
                       ln1g_ref, ln1b_ref, w1_ref, b1_ref,
                       w2_ref, b2_ref, ln2g_ref, ln2b_ref,
                       out_ref):
    """Whole BERT-encoder forward on a single VMEM-resident activation slab.

    ids_ref:  (B, S) int32 token ids (0 = pad)
    word/pos/type_ref: embedding tables (f32)
    wqkv_ref: (L*NH, H, 3*hd) bf16 per-head fused Q/K/V weights
    other weights: stacked per-layer tensors (matmul weights bf16, rest f32)
    out_ref:  (B*S, H) f32 full hidden-state slab (strip happens in the wrapper)
    """
    batch, seq = ids_ref.shape
    rows = batch * seq
    scale = 1.0 / math.sqrt(HEAD_DIM)

    ids = ids_ref[...]                                               # (B, S) int32
    # Additive attention bias (0 for real tokens, -1e9 for pads), broadcast
    # over query rows: (B, 1, S).  Built once, reused by every layer/head.
    bias3 = jnp.where(ids == 0, NEG_INF, 0.0).astype(jnp.float32)[:, None, :]

    # --- embeddings: one-hot matmul "gather" (exact lookup, MXU, lowering-safe)
    onehot = (ids[:, :, None]
              == lax.broadcasted_iota(jnp.int32, (batch, seq, VOCAB), 2))
    onehot2 = onehot.astype(jnp.float32).reshape(rows, VOCAB)        # (B*S, V)
    wordv = jnp.dot(onehot2, word_ref[...],
                    preferred_element_type=jnp.float32)              # (B*S, H)
    posv = jnp.tile(pos_ref[0:seq, :], (batch, 1))                   # (B*S, H)
    x = wordv + posv + type_ref[0:1, :]                              # type id 0
    x = _layer_norm(x, emb_g_ref[...], emb_b_ref[...])               # (B*S, H) f32

    for l in range(NUM_LAYERS):                                      # static unroll
        x_bf = x.astype(jnp.bfloat16)

        # ---- multi-head self-attention: per-head projection, B-batched einsums
        ctx_heads = []
        for h in range(NUM_HEADS):
            wq_idx = l * NUM_HEADS + h
            qkv = jnp.dot(x_bf, wqkv_ref[wq_idx],
                          preferred_element_type=jnp.float32) + bqkv_ref[wq_idx]
            qkv3 = qkv.reshape(batch, seq, 3 * HEAD_DIM)             # leading split
            q = qkv3[:, :, 0:HEAD_DIM].astype(jnp.bfloat16)
            k = qkv3[:, :, HEAD_DIM:2 * HEAD_DIM].astype(jnp.bfloat16)
            v = qkv3[:, :, 2 * HEAD_DIM:3 * HEAD_DIM].astype(jnp.bfloat16)

            s = jnp.einsum("bqd,bkd->bqk", q, k,
                           preferred_element_type=jnp.float32) * scale + bias3
            s = s - jnp.max(s, axis=-1, keepdims=True)
            p = jnp.exp(s)                                           # f32 (EUP)
            p = p * pl.reciprocal(jnp.sum(p, axis=-1, keepdims=True), approx=True)
            ctx3 = jnp.einsum("bqk,bkd->bqd", p.astype(jnp.bfloat16), v,
                              preferred_element_type=jnp.float32)    # (B, S, hd)
            ctx_heads.append(ctx3.reshape(rows, HEAD_DIM))           # leading collapse
        ctx = jnp.concatenate(ctx_heads, axis=-1)                    # (B*S, H), in vregs

        # ---- attention output projection + residual + LayerNorm -------------
        attn = jnp.dot(ctx.astype(jnp.bfloat16), wo_ref[l],
                       preferred_element_type=jnp.float32) + bo_ref[l]
        x = _layer_norm(attn + x, ln1g_ref[l], ln1b_ref[l])

        # ---- feed-forward + residual + LayerNorm ----------------------------
        inter = _gelu(jnp.dot(x.astype(jnp.bfloat16), w1_ref[l],
                              preferred_element_type=jnp.float32) + b1_ref[l])
        ffn = jnp.dot(inter.astype(jnp.bfloat16), w2_ref[l],
                      preferred_element_type=jnp.float32) + b2_ref[l]
        x = _layer_norm(ffn + x, ln2g_ref[l], ln2b_ref[l])

    # Single full-slab, sublane-aligned store (no relayout, no ragged blocks).
    out_ref[...] = x


# ------------------------------------------------------------- params / wiring --

def init_params(key):
    def nrm(k, shape):
        return 0.02 * jax.random.normal(k, shape, dtype=jnp.float32)

    keys = jax.random.split(key, 4 + NUM_LAYERS)
    params = dict(
        word_emb=nrm(keys[0], (VOCAB, HIDDEN)),
        pos_emb=nrm(keys[1], (MAX_POS, HIDDEN)),
        type_emb=nrm(keys[2], (2, HIDDEN)),
        emb_ln_g=jnp.ones((HIDDEN,), jnp.float32),
        emb_ln_b=jnp.zeros((HIDDEN,), jnp.float32),
        layers=[],
    )
    for l in range(NUM_LAYERS):
        k = jax.random.split(keys[4 + l], 6)
        params["layers"].append(dict(
            wq=nrm(k[0], (HIDDEN, HIDDEN)), bq=jnp.zeros((HIDDEN,), jnp.float32),
            wk=nrm(k[1], (HIDDEN, HIDDEN)), bk=jnp.zeros((HIDDEN,), jnp.float32),
            wv=nrm(k[2], (HIDDEN, HIDDEN)), bv=jnp.zeros((HIDDEN,), jnp.float32),
            wo=nrm(k[3], (HIDDEN, HIDDEN)), bo=jnp.zeros((HIDDEN,), jnp.float32),
            ln1_g=jnp.ones((HIDDEN,), jnp.float32),
            ln1_b=jnp.zeros((HIDDEN,), jnp.float32),
            w1=nrm(k[4], (HIDDEN, INTERMEDIATE)),
            b1=jnp.zeros((INTERMEDIATE,), jnp.float32),
            w2=nrm(k[5], (INTERMEDIATE, HIDDEN)),
            b2=jnp.zeros((HIDDEN,), jnp.float32),
            ln2_g=jnp.ones((HIDDEN,), jnp.float32),
            ln2_b=jnp.zeros((HIDDEN,), jnp.float32),
        ))
    return params


def pack_params(params):
    """Pack per-head fused QKV weights and stack per-layer params.

    Matmul weights are stored bf16 (MXU-native on all three generations);
    biases / LayerNorm params / embedding tables stay f32.
    """
    layers = params["layers"]
    hd = HEAD_DIM

    wqkv, bqkv = [], []
    for lyr in layers:
        for h in range(NUM_HEADS):
            sl = slice(h * hd, (h + 1) * hd)
            wqkv.append(jnp.concatenate(
                [lyr["wq"][:, sl], lyr["wk"][:, sl], lyr["wv"][:, sl]], axis=1))
            bqkv.append(jnp.concatenate(
                [lyr["bq"][sl], lyr["bk"][sl], lyr["bv"][sl]])[None, :])

    def stack_mat(name):
        return jnp.stack([lyr[name] for lyr in layers]).astype(jnp.bfloat16)

    def stack_row(name):
        return jnp.stack([lyr[name][None, :] for lyr in layers])

    return dict(
        word_emb=params["word_emb"],
        pos_emb=params["pos_emb"],
        type_emb=params["type_emb"],
        emb_ln_g=params["emb_ln_g"].reshape(1, HIDDEN),
        emb_ln_b=params["emb_ln_b"].reshape(1, HIDDEN),
        wqkv=jnp.stack(wqkv).astype(jnp.bfloat16),     # (L*NH, H, 3*hd) bf16
        bqkv=jnp.stack(bqkv),                          # (L*NH, 1, 3*hd) f32
        wo=stack_mat("wo"), bo=stack_row("bo"),
        ln1_g=stack_row("ln1_g"), ln1_b=stack_row("ln1_b"),
        w1=stack_mat("w1"), b1=stack_row("b1"),
        w2=stack_mat("w2"), b2=stack_row("b2"),
        ln2_g=stack_row("ln2_g"), ln2_b=stack_row("ln2_b"),
    )


@jax.jit
def claim_encoder_forward(input_ids, packed):
    """Pallas equivalent of ClaimEncoder.forward (inference / eval mode)."""
    b, n = input_ids.shape
    if n > MAX_POS:  # static shape under jit; guard the positional table
        raise ValueError(f"sequence length {n} exceeds MAX_POS={MAX_POS}")

    full = pl.pallas_call(
        _fused_bert_kernel,
        out_shape=jax.ShapeDtypeStruct((b * n, HIDDEN), jnp.float32),
    )(input_ids.astype(jnp.int32),
      packed["word_emb"], packed["pos_emb"], packed["type_emb"],
      packed["emb_ln_g"], packed["emb_ln_b"],
      packed["wqkv"], packed["bqkv"], packed["wo"], packed["bo"],
      packed["ln1_g"], packed["ln1_b"], packed["w1"], packed["b1"],
      packed["w2"], packed["b2"], packed["ln2_g"], packed["ln2_b"])

    # nn.Dropout(p) is identity at inference time (module in eval mode).
    # Strip [CLS] (row 0) and [SEP] (row n-1) with a cheap XLA slice so the
    # kernel's output store stays lane/sublane-dense and unmasked.
    h = full.reshape(b, n, HIDDEN)
    return h[:, 1:n - 1, :]


if __name__ == "__main__":
    key = jax.random.PRNGKey(0)
    pkey, ikey = jax.random.split(key)
    packed = pack_params(init_params(pkey))

    B, S = 2, 8
    input_ids = jax.random.randint(ikey, (B, S), 1, VOCAB, dtype=jnp.int32)
    # Zero-pad the tail of the second sequence to exercise the attention mask.
    input_ids = input_ids.at[1, 6:].set(0)

    out = claim_encoder_forward(input_ids, packed)
    out = jax.block_until_ready(out)
    assert out.shape == (B, S - 2, HIDDEN), out.shape
    assert bool(jnp.all(jnp.isfinite(out)))
    print("KERNEL_OK")
</pallas_src>

<mosaic_0001>
module attributes {stable_mosaic.version = 11 : i64} {
  func.func @_fused_bert_kernel(%arg0: memref<2x8xi32, #tpu.memory_space<vmem>>, %arg1: memref<64x32xf32, #tpu.memory_space<vmem>>, %arg2: memref<16x32xf32, #tpu.memory_space<vmem>>, %arg3: memref<2x32xf32, #tpu.memory_space<vmem>>, %arg4: memref<1x32xf32, #tpu.memory_space<vmem>>, %arg5: memref<1x32xf32, #tpu.memory_space<vmem>>, %arg6: memref<4x32x48xbf16, #tpu.memory_space<vmem>>, %arg7: memref<4x1x48xf32, #tpu.memory_space<vmem>>, %arg8: memref<2x32x32xbf16, #tpu.memory_space<vmem>>, %arg9: memref<2x1x32xf32, #tpu.memory_space<vmem>>, %arg10: memref<2x1x32xf32, #tpu.memory_space<vmem>>, %arg11: memref<2x1x32xf32, #tpu.memory_space<vmem>>, %arg12: memref<2x32x64xbf16, #tpu.memory_space<vmem>>, %arg13: memref<2x1x64xf32, #tpu.memory_space<vmem>>, %arg14: memref<2x64x32xbf16, #tpu.memory_space<vmem>>, %arg15: memref<2x1x32xf32, #tpu.memory_space<vmem>>, %arg16: memref<2x1x32xf32, #tpu.memory_space<vmem>>, %arg17: memref<2x1x32xf32, #tpu.memory_space<vmem>>, %arg18: memref<16x32xf32, #tpu.memory_space<vmem>>) attributes {dimension_semantics = [], scalar_prefetch = 0 : i64, scratch_operands = 0 : i64, tpu.core_type = #tpu.core_type<tc>} {
    %c0 = arith.constant 0 : index
    %c0_0 = arith.constant 0 : index
    %0 = vector.load %arg0[%c0, %c0_0] : memref<2x8xi32, #tpu.memory_space<vmem>>, vector<2x8xi32>
    %c0_i32 = arith.constant 0 : i32
    %1 = vector.broadcast %c0_i32 : i32 to vector<2x8xi32>
    %2 = arith.cmpi eq, %0, %1 : vector<2x8xi32>
    %cst = arith.constant -1.000000e+09 : f32
    %cst_1 = arith.constant 0.000000e+00 : f32
    %3 = vector.broadcast %cst : f32 to vector<2x8xf32>
    %4 = vector.broadcast %cst_1 : f32 to vector<2x8xf32>
    %5 = arith.select %2, %3, %4 : vector<2x8xi1>, vector<2x8xf32>
    %6 = vector.shape_cast %5 : vector<2x8xf32> to vector<2x1x8xf32>
    %7 = vector.shape_cast %0 : vector<2x8xi32> to vector<2x8x1xi32>
    %8 = tpu.iota {dimensions = array<i32: 2>} : vector<2x8x64xi32>
    %9 = vector.broadcast %7 : vector<2x8x1xi32> to vector<2x8x64xi32>
    %10 = arith.cmpi eq, %9, %8 : vector<2x8x64xi32>
    %11 = arith.extui %10 : vector<2x8x64xi1> to vector<2x8x64xi32>
    %12 = arith.sitofp %11 : vector<2x8x64xi32> to vector<2x8x64xf32>
    %13 = vector.shape_cast %12 : vector<2x8x64xf32> to vector<16x64xf32>
    %c0_2 = arith.constant 0 : index
    %c0_3 = arith.constant 0 : index
    %14 = vector.load %arg1[%c0_2, %c0_3] : memref<64x32xf32, #tpu.memory_space<vmem>>, vector<64x32xf32>
    %cst_4 = arith.constant dense<0.000000e+00> : vector<16x32xf32>
    %15 = tpu.matmul %13, %14, %cst_4 {dimension_numbers = #tpu.dot_dimension_numbers<[1], [0], [0], [1], [0, 0, 1, 1], [], []>} : vector<16x64xf32>, vector<64x32xf32>, vector<16x32xf32> -> vector<16x32xf32>
    %c0_5 = arith.constant 0 : index
    %c0_6 = arith.constant 0 : index
    %16 = vector.load %arg2[%c0_5, %c0_6] : memref<16x32xf32, #tpu.memory_space<vmem>>, vector<8x32xf32>
    %17 = tpu.concatenate %16, %16 in 0 : vector<8x32xf32>, vector<8x32xf32> -> vector<16x32xf32>
    %18 = arith.addf %15, %17 : vector<16x32xf32>
    %c0_7 = arith.constant 0 : index
    %c0_8 = arith.constant 0 : index
    %19 = vector.load %arg3[%c0_7, %c0_8] : memref<2x32xf32, #tpu.memory_space<vmem>>, vector<1x32xf32>
    %20 = vector.broadcast %19 : vector<1x32xf32> to vector<16x32xf32>
    %21 = arith.addf %18, %20 : vector<16x32xf32>
    %c0_9 = arith.constant 0 : index
    %c0_10 = arith.constant 0 : index
    %22 = vector.load %arg4[%c0_9, %c0_10] : memref<1x32xf32, #tpu.memory_space<vmem>>, vector<1x32xf32>
    %c0_11 = arith.constant 0 : index
    %c0_12 = arith.constant 0 : index
    %23 = vector.load %arg5[%c0_11, %c0_12] : memref<1x32xf32, #tpu.memory_space<vmem>>, vector<1x32xf32>
    %cst_13 = arith.constant dense<0.000000e+00> : vector<16xf32>
    %24 = vector.multi_reduction <add>, %21, %cst_13 [1] : vector<16x32xf32> to vector<16xf32>
    %25 = vector.shape_cast %24 : vector<16xf32> to vector<16x1xf32>
    %cst_14 = arith.constant 3.200000e+01 : f32
    %26 = vector.broadcast %cst_14 : f32 to vector<16x1xf32>
    %27 = arith.divf %25, %26 : vector<16x1xf32>
    %28 = vector.broadcast %27 : vector<16x1xf32> to vector<16x32xf32>
    %29 = arith.subf %21, %28 : vector<16x32xf32>
    %30 = arith.mulf %29, %29 : vector<16x32xf32>
    %cst_15 = arith.constant dense<0.000000e+00> : vector<16xf32>
    %31 = vector.multi_reduction <add>, %30, %cst_15 [1] : vector<16x32xf32> to vector<16xf32>
    %32 = vector.shape_cast %31 : vector<16xf32> to vector<16x1xf32>
    %cst_16 = arith.constant 3.200000e+01 : f32
    %33 = vector.broadcast %cst_16 : f32 to vector<16x1xf32>
    %34 = arith.divf %32, %33 : vector<16x1xf32>
    %cst_17 = arith.constant 9.99999996E-13 : f32
    %35 = vector.broadcast %cst_17 : f32 to vector<16x1xf32>
    %36 = arith.addf %34, %35 : vector<16x1xf32>
    %37 = math.rsqrt %36 : vector<16x1xf32>
    %38 = vector.broadcast %37 : vector<16x1xf32> to vector<16x32xf32>
    %39 = arith.mulf %29, %38 : vector<16x32xf32>
    %40 = vector.broadcast %22 : vector<1x32xf32> to vector<16x32xf32>
    %41 = arith.mulf %39, %40 : vector<16x32xf32>
    %42 = vector.broadcast %23 : vector<1x32xf32> to vector<16x32xf32>
    %43 = arith.addf %41, %42 : vector<16x32xf32>
    %44 = arith.truncf %43 : vector<16x32xf32> to vector<16x32xbf16>
    %c0_18 = arith.constant 0 : index
    %c0_19 = arith.constant 0 : index
    %c0_20 = arith.constant 0 : index
    %45 = vector.load %arg6[%c0_18, %c0_19, %c0_20] : memref<4x32x48xbf16, #tpu.memory_space<vmem>>, vector<1x32x48xbf16>
    %46 = vector.shape_cast %45 : vector<1x32x48xbf16> to vector<32x48xbf16>
    %cst_21 = arith.constant dense<0.000000e+00> : vector<16x48xf32>
    %47 = tpu.matmul %44, %46, %cst_21 {dimension_numbers = #tpu.dot_dimension_numbers<[1], [0], [0], [1], [0, 0, 1, 1], [], []>} : vector<16x32xbf16>, vector<32x48xbf16>, vector<16x48xf32> -> vector<16x48xf32>
    %c0_22 = arith.constant 0 : index
    %c0_23 = arith.constant 0 : index
    %c0_24 = arith.constant 0 : index
    %48 = vector.load %arg7[%c0_22, %c0_23, %c0_24] : memref<4x1x48xf32, #tpu.memory_space<vmem>>, vector<1x1x48xf32>
    %49 = vector.shape_cast %48 : vector<1x1x48xf32> to vector<1x48xf32>
    %50 = vector.broadcast %49 : vector<1x48xf32> to vector<16x48xf32>
    %51 = arith.addf %47, %50 : vector<16x48xf32>
    %52 = vector.shape_cast %51 : vector<16x48xf32> to vector<2x8x48xf32>
    %53 = vector.extract_strided_slice %52 {offsets = [0, 0, 0], sizes = [2, 8, 16], strides = [1, 1, 1]} : vector<2x8x48xf32> to vector<2x8x16xf32>
    %54 = arith.truncf %53 : vector<2x8x16xf32> to vector<2x8x16xbf16>
    %55 = vector.extract_strided_slice %52 {offsets = [0, 0, 16], sizes = [2, 8, 16], strides = [1, 1, 1]} : vector<2x8x48xf32> to vector<2x8x16xf32>
    %56 = arith.truncf %55 : vector<2x8x16xf32> to vector<2x8x16xbf16>
    %57 = vector.extract_strided_slice %52 {offsets = [0, 0, 32], sizes = [2, 8, 16], strides = [1, 1, 1]} : vector<2x8x48xf32> to vector<2x8x16xf32>
    %58 = arith.truncf %57 : vector<2x8x16xf32> to vector<2x8x16xbf16>
    "tpu.trace_start"() <{level = 10 : i32, message = "bqd,bkd->bqk"}> : () -> ()
    %cst_25 = arith.constant dense<0.000000e+00> : vector<2x8x8xf32>
    %59 = tpu.matmul %54, %56, %cst_25 {dimension_numbers = #tpu.dot_dimension_numbers<[2], [2], [1], [1], [0, 0, 0, 1, 1, 1], [0], [0]>} : vector<2x8x16xbf16>, vector<2x8x16xbf16>, vector<2x8x8xf32> -> vector<2x8x8xf32>
    "tpu.trace_stop"() : () -> ()
    %cst_26 = arith.constant 2.500000e-01 : f32
    %60 = vector.broadcast %cst_26 : f32 to vector<2x8x8xf32>
    %61 = arith.mulf %59, %60 : vector<2x8x8xf32>
    %62 = vector.broadcast %6 : vector<2x1x8xf32> to vector<2x8x8xf32>
    %63 = arith.addf %61, %62 : vector<2x8x8xf32>
    %cst_27 = arith.constant dense<0xFF800000> : vector<2x8xf32>
    %64 = vector.multi_reduction <maximumf>, %63, %cst_27 [2] : vector<2x8x8xf32> to vector<2x8xf32>
    %65 = vector.shape_cast %64 : vector<2x8xf32> to vector<2x8x1xf32>
    %66 = vector.broadcast %65 : vector<2x8x1xf32> to vector<2x8x8xf32>
    %67 = arith.subf %63, %66 : vector<2x8x8xf32>
    %68 = math.exp %67 : vector<2x8x8xf32>
    %cst_28 = arith.constant dense<0.000000e+00> : vector<2x8xf32>
    %69 = vector.multi_reduction <add>, %68, %cst_28 [2] : vector<2x8x8xf32> to vector<2x8xf32>
    %70 = vector.shape_cast %69 : vector<2x8xf32> to vector<2x8x1xf32>
    %71 = tpu.reciprocal %70 {approx = true} : vector<2x8x1xf32> -> vector<2x8x1xf32>
    %72 = vector.broadcast %71 : vector<2x8x1xf32> to vector<2x8x8xf32>
    %73 = arith.mulf %68, %72 : vector<2x8x8xf32>
    %74 = arith.truncf %73 : vector<2x8x8xf32> to vector<2x8x8xbf16>
    "tpu.trace_start"() <{level = 10 : i32, message = "bqk,bkd->bqd"}> : () -> ()
    %cst_29 = arith.constant dense<0.000000e+00> : vector<2x8x16xf32>
    %75 = tpu.matmul %74, %58, %cst_29 {dimension_numbers = #tpu.dot_dimension_numbers<[2], [1], [1], [2], [0, 0, 0, 1, 1, 2], [0], [0]>} : vector<2x8x8xbf16>, vector<2x8x16xbf16>, vector<2x8x16xf32> -> vector<2x8x16xf32>
    "tpu.trace_stop"() : () -> ()
    %76 = vector.shape_cast %75 : vector<2x8x16xf32> to vector<16x16xf32>
    %c1 = arith.constant 1 : index
    %c0_30 = arith.constant 0 : index
    %c0_31 = arith.constant 0 : index
    %77 = vector.load %arg6[%c1, %c0_30, %c0_31] : memref<4x32x48xbf16, #tpu.memory_space<vmem>>, vector<1x32x48xbf16>
    %78 = vector.shape_cast %77 : vector<1x32x48xbf16> to vector<32x48xbf16>
    %cst_32 = arith.constant dense<0.000000e+00> : vector<16x48xf32>
    %79 = tpu.matmul %44, %78, %cst_32 {dimension_numbers = #tpu.dot_dimension_numbers<[1], [0], [0], [1], [0, 0, 1, 1], [], []>} : vector<16x32xbf16>, vector<32x48xbf16>, vector<16x48xf32> -> vector<16x48xf32>
    %c1_33 = arith.constant 1 : index
    %c0_34 = arith.constant 0 : index
    %c0_35 = arith.constant 0 : index
    %80 = vector.load %arg7[%c1_33, %c0_34, %c0_35] : memref<4x1x48xf32, #tpu.memory_space<vmem>>, vector<1x1x48xf32>
    %81 = vector.shape_cast %80 : vector<1x1x48xf32> to vector<1x48xf32>
    %82 = vector.broadcast %81 : vector<1x48xf32> to vector<16x48xf32>
    %83 = arith.addf %79, %82 : vector<16x48xf32>
    %84 = vector.shape_cast %83 : vector<16x48xf32> to vector<2x8x48xf32>
    %85 = vector.extract_strided_slice %84 {offsets = [0, 0, 0], sizes = [2, 8, 16], strides = [1, 1, 1]} : vector<2x8x48xf32> to vector<2x8x16xf32>
    %86 = arith.truncf %85 : vector<2x8x16xf32> to vector<2x8x16xbf16>
    %87 = vector.extract_strided_slice %84 {offsets = [0, 0, 16], sizes = [2, 8, 16], strides = [1, 1, 1]} : vector<2x8x48xf32> to vector<2x8x16xf32>
    %88 = arith.truncf %87 : vector<2x8x16xf32> to vector<2x8x16xbf16>
    %89 = vector.extract_strided_slice %84 {offsets = [0, 0, 32], sizes = [2, 8, 16], strides = [1, 1, 1]} : vector<2x8x48xf32> to vector<2x8x16xf32>
    %90 = arith.truncf %89 : vector<2x8x16xf32> to vector<2x8x16xbf16>
    "tpu.trace_start"() <{level = 10 : i32, message = "bqd,bkd->bqk"}> : () -> ()
    %cst_36 = arith.constant dense<0.000000e+00> : vector<2x8x8xf32>
    %91 = tpu.matmul %86, %88, %cst_36 {dimension_numbers = #tpu.dot_dimension_numbers<[2], [2], [1], [1], [0, 0, 0, 1, 1, 1], [0], [0]>} : vector<2x8x16xbf16>, vector<2x8x16xbf16>, vector<2x8x8xf32> -> vector<2x8x8xf32>
    "tpu.trace_stop"() : () -> ()
    %cst_37 = arith.constant 2.500000e-01 : f32
    %92 = vector.broadcast %cst_37 : f32 to vector<2x8x8xf32>
    %93 = arith.mulf %91, %92 : vector<2x8x8xf32>
    %94 = vector.broadcast %6 : vector<2x1x8xf32> to vector<2x8x8xf32>
    %95 = arith.addf %93, %94 : vector<2x8x8xf32>
    %cst_38 = arith.constant dense<0xFF800000> : vector<2x8xf32>
    %96 = vector.multi_reduction <maximumf>, %95, %cst_38 [2] : vector<2x8x8xf32> to vector<2x8xf32>
    %97 = vector.shape_cast %96 : vector<2x8xf32> to vector<2x8x1xf32>
    %98 = vector.broadcast %97 : vector<2x8x1xf32> to vector<2x8x8xf32>
    %99 = arith.subf %95, %98 : vector<2x8x8xf32>
    %100 = math.exp %99 : vector<2x8x8xf32>
    %cst_39 = arith.constant dense<0.000000e+00> : vector<2x8xf32>
    %101 = vector.multi_reduction <add>, %100, %cst_39 [2] : vector<2x8x8xf32> to vector<2x8xf32>
    %102 = vector.shape_cast %101 : vector<2x8xf32> to vector<2x8x1xf32>
    %103 = tpu.reciprocal %102 {approx = true} : vector<2x8x1xf32> -> vector<2x8x1xf32>
    %104 = vector.broadcast %103 : vector<2x8x1xf32> to vector<2x8x8xf32>
    %105 = arith.mulf %100, %104 : vector<2x8x8xf32>
    %106 = arith.truncf %105 : vector<2x8x8xf32> to vector<2x8x8xbf16>
    "tpu.trace_start"() <{level = 10 : i32, message = "bqk,bkd->bqd"}> : () -> ()
    %cst_40 = arith.constant dense<0.000000e+00> : vector<2x8x16xf32>
    %107 = tpu.matmul %106, %90, %cst_40 {dimension_numbers = #tpu.dot_dimension_numbers<[2], [1], [1], [2], [0, 0, 0, 1, 1, 2], [0], [0]>} : vector<2x8x8xbf16>, vector<2x8x16xbf16>, vector<2x8x16xf32> -> vector<2x8x16xf32>
    "tpu.trace_stop"() : () -> ()
    %108 = vector.shape_cast %107 : vector<2x8x16xf32> to vector<16x16xf32>
    %109 = tpu.concatenate %76, %108 in 1 : vector<16x16xf32>, vector<16x16xf32> -> vector<16x32xf32>
    %110 = arith.truncf %109 : vector<16x32xf32> to vector<16x32xbf16>
    %c0_41 = arith.constant 0 : index
    %c0_42 = arith.constant 0 : index
    %c0_43 = arith.constant 0 : index
    %111 = vector.load %arg8[%c0_41, %c0_42, %c0_43] : memref<2x32x32xbf16, #tpu.memory_space<vmem>>, vector<1x32x32xbf16>
    %112 = vector.shape_cast %111 : vector<1x32x32xbf16> to vector<32x32xbf16>
    %cst_44 = arith.constant dense<0.000000e+00> : vector<16x32xf32>
    %113 = tpu.matmul %110, %112, %cst_44 {dimension_numbers = #tpu.dot_dimension_numbers<[1], [0], [0], [1], [0, 0, 1, 1], [], []>} : vector<16x32xbf16>, vector<32x32xbf16>, vector<16x32xf32> -> vector<16x32xf32>
    %c0_45 = arith.constant 0 : index
    %c0_46 = arith.constant 0 : index
    %c0_47 = arith.constant 0 : index
    %114 = vector.load %arg9[%c0_45, %c0_46, %c0_47] : memref<2x1x32xf32, #tpu.memory_space<vmem>>, vector<1x1x32xf32>
    %115 = vector.shape_cast %114 : vector<1x1x32xf32> to vector<1x32xf32>
    %116 = vector.broadcast %115 : vector<1x32xf32> to vector<16x32xf32>
    %117 = arith.addf %113, %116 : vector<16x32xf32>
    %118 = arith.addf %117, %43 : vector<16x32xf32>
    %c0_48 = arith.constant 0 : index
    %c0_49 = arith.constant 0 : index
    %c0_50 = arith.constant 0 : index
    %119 = vector.load %arg10[%c0_48, %c0_49, %c0_50] : memref<2x1x32xf32, #tpu.memory_space<vmem>>, vector<1x1x32xf32>
    %120 = vector.shape_cast %119 : vector<1x1x32xf32> to vector<1x32xf32>
    %c0_51 = arith.constant 0 : index
    %c0_52 = arith.constant 0 : index
    %c0_53 = arith.constant 0 : index
    %121 = vector.load %arg11[%c0_51, %c0_52, %c0_53] : memref<2x1x32xf32, #tpu.memory_space<vmem>>, vector<1x1x32xf32>
    %122 = vector.shape_cast %121 : vector<1x1x32xf32> to vector<1x32xf32>
    %cst_54 = arith.constant dense<0.000000e+00> : vector<16xf32>
    %123 = vector.multi_reduction <add>, %118, %cst_54 [1] : vector<16x32xf32> to vector<16xf32>
    %124 = vector.shape_cast %123 : vector<16xf32> to vector<16x1xf32>
    %cst_55 = arith.constant 3.200000e+01 : f32
    %125 = vector.broadcast %cst_55 : f32 to vector<16x1xf32>
    %126 = arith.divf %124, %125 : vector<16x1xf32>
    %127 = vector.broadcast %126 : vector<16x1xf32> to vector<16x32xf32>
    %128 = arith.subf %118, %127 : vector<16x32xf32>
    %129 = arith.mulf %128, %128 : vector<16x32xf32>
    %cst_56 = arith.constant dense<0.000000e+00> : vector<16xf32>
    %130 = vector.multi_reduction <add>, %129, %cst_56 [1] : vector<16x32xf32> to vector<16xf32>
    %131 = vector.shape_cast %130 : vector<16xf32> to vector<16x1xf32>
    %cst_57 = arith.constant 3.200000e+01 : f32
    %132 = vector.broadcast %cst_57 : f32 to vector<16x1xf32>
    %133 = arith.divf %131, %132 : vector<16x1xf32>
    %cst_58 = arith.constant 9.99999996E-13 : f32
    %134 = vector.broadcast %cst_58 : f32 to vector<16x1xf32>
    %135 = arith.addf %133, %134 : vector<16x1xf32>
    %136 = math.rsqrt %135 : vector<16x1xf32>
    %137 = vector.broadcast %136 : vector<16x1xf32> to vector<16x32xf32>
    %138 = arith.mulf %128, %137 : vector<16x32xf32>
    %139 = vector.broadcast %120 : vector<1x32xf32> to vector<16x32xf32>
    %140 = arith.mulf %138, %139 : vector<16x32xf32>
    %141 = vector.broadcast %122 : vector<1x32xf32> to vector<16x32xf32>
    %142 = arith.addf %140, %141 : vector<16x32xf32>
    %143 = arith.truncf %142 : vector<16x32xf32> to vector<16x32xbf16>
    %c0_59 = arith.constant 0 : index
    %c0_60 = arith.constant 0 : index
    %c0_61 = arith.constant 0 : index
    %144 = vector.load %arg12[%c0_59, %c0_60, %c0_61] : memref<2x32x64xbf16, #tpu.memory_space<vmem>>, vector<1x32x64xbf16>
    %145 = vector.shape_cast %144 : vector<1x32x64xbf16> to vector<32x64xbf16>
    %cst_62 = arith.constant dense<0.000000e+00> : vector<16x64xf32>
    %146 = tpu.matmul %143, %145, %cst_62 {dimension_numbers = #tpu.dot_dimension_numbers<[1], [0], [0], [1], [0, 0, 1, 1], [], []>} : vector<16x32xbf16>, vector<32x64xbf16>, vector<16x64xf32> -> vector<16x64xf32>
    %c0_63 = arith.constant 0 : index
    %c0_64 = arith.constant 0 : index
    %c0_65 = arith.constant 0 : index
    %147 = vector.load %arg13[%c0_63, %c0_64, %c0_65] : memref<2x1x64xf32, #tpu.memory_space<vmem>>, vector<1x1x64xf32>
    %148 = vector.shape_cast %147 : vector<1x1x64xf32> to vector<1x64xf32>
    %149 = vector.broadcast %148 : vector<1x64xf32> to vector<16x64xf32>
    %150 = arith.addf %146, %149 : vector<16x64xf32>
    %cst_66 = arith.constant 5.000000e-01 : f32
    %151 = vector.broadcast %cst_66 : f32 to vector<16x64xf32>
    %152 = arith.mulf %151, %150 : vector<16x64xf32>
    %cst_67 = arith.constant 4.471500e-02 : f32
    %153 = vector.broadcast %cst_67 : f32 to vector<16x64xf32>
    %154 = arith.mulf %153, %150 : vector<16x64xf32>
    %155 = arith.mulf %154, %150 : vector<16x64xf32>
    %156 = arith.mulf %155, %150 : vector<16x64xf32>
    %157 = arith.addf %150, %156 : vector<16x64xf32>
    %cst_68 = arith.constant 0.797884583 : f32
    %158 = vector.broadcast %cst_68 : f32 to vector<16x64xf32>
    %159 = arith.mulf %158, %157 : vector<16x64xf32>
    %160 = math.tanh %159 : vector<16x64xf32>
    %cst_69 = arith.constant 1.000000e+00 : f32
    %161 = vector.broadcast %cst_69 : f32 to vector<16x64xf32>
    %162 = arith.addf %161, %160 : vector<16x64xf32>
    %163 = arith.mulf %152, %162 : vector<16x64xf32>
    %164 = arith.truncf %163 : vector<16x64xf32> to vector<16x64xbf16>
    %c0_70 = arith.constant 0 : index
    %c0_71 = arith.constant 0 : index
    %c0_72 = arith.constant 0 : index
    %165 = vector.load %arg14[%c0_70, %c0_71, %c0_72] : memref<2x64x32xbf16, #tpu.memory_space<vmem>>, vector<1x64x32xbf16>
    %166 = vector.shape_cast %165 : vector<1x64x32xbf16> to vector<64x32xbf16>
    %cst_73 = arith.constant dense<0.000000e+00> : vector<16x32xf32>
    %167 = tpu.matmul %164, %166, %cst_73 {dimension_numbers = #tpu.dot_dimension_numbers<[1], [0], [0], [1], [0, 0, 1, 1], [], []>} : vector<16x64xbf16>, vector<64x32xbf16>, vector<16x32xf32> -> vector<16x32xf32>
    %c0_74 = arith.constant 0 : index
    %c0_75 = arith.constant 0 : index
    %c0_76 = arith.constant 0 : index
    %168 = vector.load %arg15[%c0_74, %c0_75, %c0_76] : memref<2x1x32xf32, #tpu.memory_space<vmem>>, vector<1x1x32xf32>
    %169 = vector.shape_cast %168 : vector<1x1x32xf32> to vector<1x32xf32>
    %170 = vector.broadcast %169 : vector<1x32xf32> to vector<16x32xf32>
    %171 = arith.addf %167, %170 : vector<16x32xf32>
    %172 = arith.addf %171, %142 : vector<16x32xf32>
    %c0_77 = arith.constant 0 : index
    %c0_78 = arith.constant 0 : index
    %c0_79 = arith.constant 0 : index
    %173 = vector.load %arg16[%c0_77, %c0_78, %c0_79] : memref<2x1x32xf32, #tpu.memory_space<vmem>>, vector<1x1x32xf32>
    %174 = vector.shape_cast %173 : vector<1x1x32xf32> to vector<1x32xf32>
    %c0_80 = arith.constant 0 : index
    %c0_81 = arith.constant 0 : index
    %c0_82 = arith.constant 0 : index
    %175 = vector.load %arg17[%c0_80, %c0_81, %c0_82] : memref<2x1x32xf32, #tpu.memory_space<vmem>>, vector<1x1x32xf32>
    %176 = vector.shape_cast %175 : vector<1x1x32xf32> to vector<1x32xf32>
    %cst_83 = arith.constant dense<0.000000e+00> : vector<16xf32>
    %177 = vector.multi_reduction <add>, %172, %cst_83 [1] : vector<16x32xf32> to vector<16xf32>
    %178 = vector.shape_cast %177 : vector<16xf32> to vector<16x1xf32>
    %cst_84 = arith.constant 3.200000e+01 : f32
    %179 = vector.broadcast %cst_84 : f32 to vector<16x1xf32>
    %180 = arith.divf %178, %179 : vector<16x1xf32>
    %181 = vector.broadcast %180 : vector<16x1xf32> to vector<16x32xf32>
    %182 = arith.subf %172, %181 : vector<16x32xf32>
    %183 = arith.mulf %182, %182 : vector<16x32xf32>
    %cst_85 = arith.constant dense<0.000000e+00> : vector<16xf32>
    %184 = vector.multi_reduction <add>, %183, %cst_85 [1] : vector<16x32xf32> to vector<16xf32>
    %185 = vector.shape_cast %184 : vector<16xf32> to vector<16x1xf32>
    %cst_86 = arith.constant 3.200000e+01 : f32
    %186 = vector.broadcast %cst_86 : f32 to vector<16x1xf32>
    %187 = arith.divf %185, %186 : vector<16x1xf32>
    %cst_87 = arith.constant 9.99999996E-13 : f32
    %188 = vector.broadcast %cst_87 : f32 to vector<16x1xf32>
    %189 = arith.addf %187, %188 : vector<16x1xf32>
    %190 = math.rsqrt %189 : vector<16x1xf32>
    %191 = vector.broadcast %190 : vector<16x1xf32> to vector<16x32xf32>
    %192 = arith.mulf %182, %191 : vector<16x32xf32>
    %193 = vector.broadcast %174 : vector<1x32xf32> to vector<16x32xf32>
    %194 = arith.mulf %192, %193 : vector<16x32xf32>
    %195 = vector.broadcast %176 : vector<1x32xf32> to vector<16x32xf32>
    %196 = arith.addf %194, %195 : vector<16x32xf32>
    %197 = arith.truncf %196 : vector<16x32xf32> to vector<16x32xbf16>
    %c2 = arith.constant 2 : index
    %c0_88 = arith.constant 0 : index
    %c0_89 = arith.constant 0 : index
    %198 = vector.load %arg6[%c2, %c0_88, %c0_89] : memref<4x32x48xbf16, #tpu.memory_space<vmem>>, vector<1x32x48xbf16>
    %199 = vector.shape_cast %198 : vector<1x32x48xbf16> to vector<32x48xbf16>
    %cst_90 = arith.constant dense<0.000000e+00> : vector<16x48xf32>
    %200 = tpu.matmul %197, %199, %cst_90 {dimension_numbers = #tpu.dot_dimension_numbers<[1], [0], [0], [1], [0, 0, 1, 1], [], []>} : vector<16x32xbf16>, vector<32x48xbf16>, vector<16x48xf32> -> vector<16x48xf32>
    %c2_91 = arith.constant 2 : index
    %c0_92 = arith.constant 0 : index
    %c0_93 = arith.constant 0 : index
    %201 = vector.load %arg7[%c2_91, %c0_92, %c0_93] : memref<4x1x48xf32, #tpu.memory_space<vmem>>, vector<1x1x48xf32>
    %202 = vector.shape_cast %201 : vector<1x1x48xf32> to vector<1x48xf32>
    %203 = vector.broadcast %202 : vector<1x48xf32> to vector<16x48xf32>
    %204 = arith.addf %200, %203 : vector<16x48xf32>
    %205 = vector.shape_cast %204 : vector<16x48xf32> to vector<2x8x48xf32>
    %206 = vector.extract_strided_slice %205 {offsets = [0, 0, 0], sizes = [2, 8, 16], strides = [1, 1, 1]} : vector<2x8x48xf32> to vector<2x8x16xf32>
    %207 = arith.truncf %206 : vector<2x8x16xf32> to vector<2x8x16xbf16>
    %208 = vector.extract_strided_slice %205 {offsets = [0, 0, 16], sizes = [2, 8, 16], strides = [1, 1, 1]} : vector<2x8x48xf32> to vector<2x8x16xf32>
    %209 = arith.truncf %208 : vector<2x8x16xf32> to vector<2x8x16xbf16>
    %210 = vector.extract_strided_slice %205 {offsets = [0, 0, 32], sizes = [2, 8, 16], strides = [1, 1, 1]} : vector<2x8x48xf32> to vector<2x8x16xf32>
    %211 = arith.truncf %210 : vector<2x8x16xf32> to vector<2x8x16xbf16>
    "tpu.trace_start"() <{level = 10 : i32, message = "bqd,bkd->bqk"}> : () -> ()
    %cst_94 = arith.constant dense<0.000000e+00> : vector<2x8x8xf32>
    %212 = tpu.matmul %207, %209, %cst_94 {dimension_numbers = #tpu.dot_dimension_numbers<[2], [2], [1], [1], [0, 0, 0, 1, 1, 1], [0], [0]>} : vector<2x8x16xbf16>, vector<2x8x16xbf16>, vector<2x8x8xf32> -> vector<2x8x8xf32>
    "tpu.trace_stop"() : () -> ()
    %cst_95 = arith.constant 2.500000e-01 : f32
    %213 = vector.broadcast %cst_95 : f32 to vector<2x8x8xf32>
    %214 = arith.mulf %212, %213 : vector<2x8x8xf32>
    %215 = vector.broadcast %6 : vector<2x1x8xf32> to vector<2x8x8xf32>
    %216 = arith.addf %214, %215 : vector<2x8x8xf32>
    %cst_96 = arith.constant dense<0xFF800000> : vector<2x8xf32>
    %217 = vector.multi_reduction <maximumf>, %216, %cst_96 [2] : vector<2x8x8xf32> to vector<2x8xf32>
    %218 = vector.shape_cast %217 : vector<2x8xf32> to vector<2x8x1xf32>
    %219 = vector.broadcast %218 : vector<2x8x1xf32> to vector<2x8x8xf32>
    %220 = arith.subf %216, %219 : vector<2x8x8xf32>
    %221 = math.exp %220 : vector<2x8x8xf32>
    %cst_97 = arith.constant dense<0.000000e+00> : vector<2x8xf32>
    %222 = vector.multi_reduction <add>, %221, %cst_97 [2] : vector<2x8x8xf32> to vector<2x8xf32>
    %223 = vector.shape_cast %222 : vector<2x8xf32> to vector<2x8x1xf32>
    %224 = tpu.reciprocal %223 {approx = true} : vector<2x8x1xf32> -> vector<2x8x1xf32>
    %225 = vector.broadcast %224 : vector<2x8x1xf32> to vector<2x8x8xf32>
    %226 = arith.mulf %221, %225 : vector<2x8x8xf32>
    %227 = arith.truncf %226 : vector<2x8x8xf32> to vector<2x8x8xbf16>
    "tpu.trace_start"() <{level = 10 : i32, message = "bqk,bkd->bqd"}> : () -> ()
    %cst_98 = arith.constant dense<0.000000e+00> : vector<2x8x16xf32>
    %228 = tpu.matmul %227, %211, %cst_98 {dimension_numbers = #tpu.dot_dimension_numbers<[2], [1], [1], [2], [0, 0, 0, 1, 1, 2], [0], [0]>} : vector<2x8x8xbf16>, vector<2x8x16xbf16>, vector<2x8x16xf32> -> vector<2x8x16xf32>
    "tpu.trace_stop"() : () -> ()
    %229 = vector.shape_cast %228 : vector<2x8x16xf32> to vector<16x16xf32>
    %c3 = arith.constant 3 : index
    %c0_99 = arith.constant 0 : index
    %c0_100 = arith.constant 0 : index
    %230 = vector.load %arg6[%c3, %c0_99, %c0_100] : memref<4x32x48xbf16, #tpu.memory_space<vmem>>, vector<1x32x48xbf16>
    %231 = vector.shape_cast %230 : vector<1x32x48xbf16> to vector<32x48xbf16>
    %cst_101 = arith.constant dense<0.000000e+00> : vector<16x48xf32>
    %232 = tpu.matmul %197, %231, %cst_101 {dimension_numbers = #tpu.dot_dimension_numbers<[1], [0], [0], [1], [0, 0, 1, 1], [], []>} : vector<16x32xbf16>, vector<32x48xbf16>, vector<16x48xf32> -> vector<16x48xf32>
    %c3_102 = arith.constant 3 : index
    %c0_103 = arith.constant 0 : index
    %c0_104 = arith.constant 0 : index
    %233 = vector.load %arg7[%c3_102, %c0_103, %c0_104] : memref<4x1x48xf32, #tpu.memory_space<vmem>>, vector<1x1x48xf32>
    %234 = vector.shape_cast %233 : vector<1x1x48xf32> to vector<1x48xf32>
    %235 = vector.broadcast %234 : vector<1x48xf32> to vector<16x48xf32>
    %236 = arith.addf %232, %235 : vector<16x48xf32>
    %237 = vector.shape_cast %236 : vector<16x48xf32> to vector<2x8x48xf32>
    %238 = vector.extract_strided_slice %237 {offsets = [0, 0, 0], sizes = [2, 8, 16], strides = [1, 1, 1]} : vector<2x8x48xf32> to vector<2x8x16xf32>
    %239 = arith.truncf %238 : vector<2x8x16xf32> to vector<2x8x16xbf16>
    %240 = vector.extract_strided_slice %237 {offsets = [0, 0, 16], sizes = [2, 8, 16], strides = [1, 1, 1]} : vector<2x8x48xf32> to vector<2x8x16xf32>
    %241 = arith.truncf %240 : vector<2x8x16xf32> to vector<2x8x16xbf16>
    %242 = vector.extract_strided_slice %237 {offsets = [0, 0, 32], sizes = [2, 8, 16], strides = [1, 1, 1]} : vector<2x8x48xf32> to vector<2x8x16xf32>
    %243 = arith.truncf %242 : vector<2x8x16xf32> to vector<2x8x16xbf16>
    "tpu.trace_start"() <{level = 10 : i32, message = "bqd,bkd->bqk"}> : () -> ()
    %cst_105 = arith.constant dense<0.000000e+00> : vector<2x8x8xf32>
    %244 = tpu.matmul %239, %241, %cst_105 {dimension_numbers = #tpu.dot_dimension_numbers<[2], [2], [1], [1], [0, 0, 0, 1, 1, 1], [0], [0]>} : vector<2x8x16xbf16>, vector<2x8x16xbf16>, vector<2x8x8xf32> -> vector<2x8x8xf32>
    "tpu.trace_stop"() : () -> ()
    %cst_106 = arith.constant 2.500000e-01 : f32
    %245 = vector.broadcast %cst_106 : f32 to vector<2x8x8xf32>
    %246 = arith.mulf %244, %245 : vector<2x8x8xf32>
    %247 = vector.broadcast %6 : vector<2x1x8xf32> to vector<2x8x8xf32>
    %248 = arith.addf %246, %247 : vector<2x8x8xf32>
    %cst_107 = arith.constant dense<0xFF800000> : vector<2x8xf32>
    %249 = vector.multi_reduction <maximumf>, %248, %cst_107 [2] : vector<2x8x8xf32> to vector<2x8xf32>
    %250 = vector.shape_cast %249 : vector<2x8xf32> to vector<2x8x1xf32>
    %251 = vector.broadcast %250 : vector<2x8x1xf32> to vector<2x8x8xf32>
    %252 = arith.subf %248, %251 : vector<2x8x8xf32>
    %253 = math.exp %252 : vector<2x8x8xf32>
    %cst_108 = arith.constant dense<0.000000e+00> : vector<2x8xf32>
    %254 = vector.multi_reduction <add>, %253, %cst_108 [2] : vector<2x8x8xf32> to vector<2x8xf32>
    %255 = vector.shape_cast %254 : vector<2x8xf32> to vector<2x8x1xf32>
    %256 = tpu.reciprocal %255 {approx = true} : vector<2x8x1xf32> -> vector<2x8x1xf32>
    %257 = vector.broadcast %256 : vector<2x8x1xf32> to vector<2x8x8xf32>
    %258 = arith.mulf %253, %257 : vector<2x8x8xf32>
    %259 = arith.truncf %258 : vector<2x8x8xf32> to vector<2x8x8xbf16>
    "tpu.trace_start"() <{level = 10 : i32, message = "bqk,bkd->bqd"}> : () -> ()
    %cst_109 = arith.constant dense<0.000000e+00> : vector<2x8x16xf32>
    %260 = tpu.matmul %259, %243, %cst_109 {dimension_numbers = #tpu.dot_dimension_numbers<[2], [1], [1], [2], [0, 0, 0, 1, 1, 2], [0], [0]>} : vector<2x8x8xbf16>, vector<2x8x16xbf16>, vector<2x8x16xf32> -> vector<2x8x16xf32>
    "tpu.trace_stop"() : () -> ()
    %261 = vector.shape_cast %260 : vector<2x8x16xf32> to vector<16x16xf32>
    %262 = tpu.concatenate %229, %261 in 1 : vector<16x16xf32>, vector<16x16xf32> -> vector<16x32xf32>
    %263 = arith.truncf %262 : vector<16x32xf32> to vector<16x32xbf16>
    %c1_110 = arith.constant 1 : index
    %c0_111 = arith.constant 0 : index
    %c0_112 = arith.constant 0 : index
    %264 = vector.load %arg8[%c1_110, %c0_111, %c0_112] : memref<2x32x32xbf16, #tpu.memory_space<vmem>>, vector<1x32x32xbf16>
    %265 = vector.shape_cast %264 : vector<1x32x32xbf16> to vector<32x32xbf16>
    %cst_113 = arith.constant dense<0.000000e+00> : vector<16x32xf32>
    %266 = tpu.matmul %263, %265, %cst_113 {dimension_numbers = #tpu.dot_dimension_numbers<[1], [0], [0], [1], [0, 0, 1, 1], [], []>} : vector<16x32xbf16>, vector<32x32xbf16>, vector<16x32xf32> -> vector<16x32xf32>
    %c1_114 = arith.constant 1 : index
    %c0_115 = arith.constant 0 : index
    %c0_116 = arith.constant 0 : index
    %267 = vector.load %arg9[%c1_114, %c0_115, %c0_116] : memref<2x1x32xf32, #tpu.memory_space<vmem>>, vector<1x1x32xf32>
    %268 = vector.shape_cast %267 : vector<1x1x32xf32> to vector<1x32xf32>
    %269 = vector.broadcast %268 : vector<1x32xf32> to vector<16x32xf32>
    %270 = arith.addf %266, %269 : vector<16x32xf32>
    %271 = arith.addf %270, %196 : vector<16x32xf32>
    %c1_117 = arith.constant 1 : index
    %c0_118 = arith.constant 0 : index
    %c0_119 = arith.constant 0 : index
    %272 = vector.load %arg10[%c1_117, %c0_118, %c0_119] : memref<2x1x32xf32, #tpu.memory_space<vmem>>, vector<1x1x32xf32>
    %273 = vector.shape_cast %272 : vector<1x1x32xf32> to vector<1x32xf32>
    %c1_120 = arith.constant 1 : index
    %c0_121 = arith.constant 0 : index
    %c0_122 = arith.constant 0 : index
    %274 = vector.load %arg11[%c1_120, %c0_121, %c0_122] : memref<2x1x32xf32, #tpu.memory_space<vmem>>, vector<1x1x32xf32>
    %275 = vector.shape_cast %274 : vector<1x1x32xf32> to vector<1x32xf32>
    %cst_123 = arith.constant dense<0.000000e+00> : vector<16xf32>
    %276 = vector.multi_reduction <add>, %271, %cst_123 [1] : vector<16x32xf32> to vector<16xf32>
    %277 = vector.shape_cast %276 : vector<16xf32> to vector<16x1xf32>
    %cst_124 = arith.constant 3.200000e+01 : f32
    %278 = vector.broadcast %cst_124 : f32 to vector<16x1xf32>
    %279 = arith.divf %277, %278 : vector<16x1xf32>
    %280 = vector.broadcast %279 : vector<16x1xf32> to vector<16x32xf32>
    %281 = arith.subf %271, %280 : vector<16x32xf32>
    %282 = arith.mulf %281, %281 : vector<16x32xf32>
    %cst_125 = arith.constant dense<0.000000e+00> : vector<16xf32>
    %283 = vector.multi_reduction <add>, %282, %cst_125 [1] : vector<16x32xf32> to vector<16xf32>
    %284 = vector.shape_cast %283 : vector<16xf32> to vector<16x1xf32>
    %cst_126 = arith.constant 3.200000e+01 : f32
    %285 = vector.broadcast %cst_126 : f32 to vector<16x1xf32>
    %286 = arith.divf %284, %285 : vector<16x1xf32>
    %cst_127 = arith.constant 9.99999996E-13 : f32
    %287 = vector.broadcast %cst_127 : f32 to vector<16x1xf32>
    %288 = arith.addf %286, %287 : vector<16x1xf32>
    %289 = math.rsqrt %288 : vector<16x1xf32>
    %290 = vector.broadcast %289 : vector<16x1xf32> to vector<16x32xf32>
    %291 = arith.mulf %281, %290 : vector<16x32xf32>
    %292 = vector.broadcast %273 : vector<1x32xf32> to vector<16x32xf32>
    %293 = arith.mulf %291, %292 : vector<16x32xf32>
    %294 = vector.broadcast %275 : vector<1x32xf32> to vector<16x32xf32>
    %295 = arith.addf %293, %294 : vector<16x32xf32>
    %296 = arith.truncf %295 : vector<16x32xf32> to vector<16x32xbf16>
    %c1_128 = arith.constant 1 : index
    %c0_129 = arith.constant 0 : index
    %c0_130 = arith.constant 0 : index
    %297 = vector.load %arg12[%c1_128, %c0_129, %c0_130] : memref<2x32x64xbf16, #tpu.memory_space<vmem>>, vector<1x32x64xbf16>
    %298 = vector.shape_cast %297 : vector<1x32x64xbf16> to vector<32x64xbf16>
    %cst_131 = arith.constant dense<0.000000e+00> : vector<16x64xf32>
    %299 = tpu.matmul %296, %298, %cst_131 {dimension_numbers = #tpu.dot_dimension_numbers<[1], [0], [0], [1], [0, 0, 1, 1], [], []>} : vector<16x32xbf16>, vector<32x64xbf16>, vector<16x64xf32> -> vector<16x64xf32>
    %c1_132 = arith.constant 1 : index
    %c0_133 = arith.constant 0 : index
    %c0_134 = arith.constant 0 : index
    %300 = vector.load %arg13[%c1_132, %c0_133, %c0_134] : memref<2x1x64xf32, #tpu.memory_space<vmem>>, vector<1x1x64xf32>
    %301 = vector.shape_cast %300 : vector<1x1x64xf32> to vector<1x64xf32>
    %302 = vector.broadcast %301 : vector<1x64xf32> to vector<16x64xf32>
    %303 = arith.addf %299, %302 : vector<16x64xf32>
    %cst_135 = arith.constant 5.000000e-01 : f32
    %304 = vector.broadcast %cst_135 : f32 to vector<16x64xf32>
    %305 = arith.mulf %304, %303 : vector<16x64xf32>
    %cst_136 = arith.constant 4.471500e-02 : f32
    %306 = vector.broadcast %cst_136 : f32 to vector<16x64xf32>
    %307 = arith.mulf %306, %303 : vector<16x64xf32>
    %308 = arith.mulf %307, %303 : vector<16x64xf32>
    %309 = arith.mulf %308, %303 : vector<16x64xf32>
    %310 = arith.addf %303, %309 : vector<16x64xf32>
    %cst_137 = arith.constant 0.797884583 : f32
    %311 = vector.broadcast %cst_137 : f32 to vector<16x64xf32>
    %312 = arith.mulf %311, %310 : vector<16x64xf32>
    %313 = math.tanh %312 : vector<16x64xf32>
    %cst_138 = arith.constant 1.000000e+00 : f32
    %314 = vector.broadcast %cst_138 : f32 to vector<16x64xf32>
    %315 = arith.addf %314, %313 : vector<16x64xf32>
    %316 = arith.mulf %305, %315 : vector<16x64xf32>
    %317 = arith.truncf %316 : vector<16x64xf32> to vector<16x64xbf16>
    %c1_139 = arith.constant 1 : index
    %c0_140 = arith.constant 0 : index
    %c0_141 = arith.constant 0 : index
    %318 = vector.load %arg14[%c1_139, %c0_140, %c0_141] : memref<2x64x32xbf16, #tpu.memory_space<vmem>>, vector<1x64x32xbf16>
    %319 = vector.shape_cast %318 : vector<1x64x32xbf16> to vector<64x32xbf16>
    %cst_142 = arith.constant dense<0.000000e+00> : vector<16x32xf32>
    %320 = tpu.matmul %317, %319, %cst_142 {dimension_numbers = #tpu.dot_dimension_numbers<[1], [0], [0], [1], [0, 0, 1, 1], [], []>} : vector<16x64xbf16>, vector<64x32xbf16>, vector<16x32xf32> -> vector<16x32xf32>
    %c1_143 = arith.constant 1 : index
    %c0_144 = arith.constant 0 : index
    %c0_145 = arith.constant 0 : index
    %321 = vector.load %arg15[%c1_143, %c0_144, %c0_145] : memref<2x1x32xf32, #tpu.memory_space<vmem>>, vector<1x1x32xf32>
    %322 = vector.shape_cast %321 : vector<1x1x32xf32> to vector<1x32xf32>
    %323 = vector.broadcast %322 : vector<1x32xf32> to vector<16x32xf32>
    %324 = arith.addf %320, %323 : vector<16x32xf32>
    %325 = arith.addf %324, %295 : vector<16x32xf32>
    %c1_146 = arith.constant 1 : index
    %c0_147 = arith.constant 0 : index
    %c0_148 = arith.constant 0 : index
    %326 = vector.load %arg16[%c1_146, %c0_147, %c0_148] : memref<2x1x32xf32, #tpu.memory_space<vmem>>, vector<1x1x32xf32>
    %327 = vector.shape_cast %326 : vector<1x1x32xf32> to vector<1x32xf32>
    %c1_149 = arith.constant 1 : index
    %c0_150 = arith.constant 0 : index
    %c0_151 = arith.constant 0 : index
    %328 = vector.load %arg17[%c1_149, %c0_150, %c0_151] : memref<2x1x32xf32, #tpu.memory_space<vmem>>, vector<1x1x32xf32>
    %329 = vector.shape_cast %328 : vector<1x1x32xf32> to vector<1x32xf32>
    %cst_152 = arith.constant dense<0.000000e+00> : vector<16xf32>
    %330 = vector.multi_reduction <add>, %325, %cst_152 [1] : vector<16x32xf32> to vector<16xf32>
    %331 = vector.shape_cast %330 : vector<16xf32> to vector<16x1xf32>
    %cst_153 = arith.constant 3.200000e+01 : f32
    %332 = vector.broadcast %cst_153 : f32 to vector<16x1xf32>
    %333 = arith.divf %331, %332 : vector<16x1xf32>
    %334 = vector.broadcast %333 : vector<16x1xf32> to vector<16x32xf32>
    %335 = arith.subf %325, %334 : vector<16x32xf32>
    %336 = arith.mulf %335, %335 : vector<16x32xf32>
    %cst_154 = arith.constant dense<0.000000e+00> : vector<16xf32>
    %337 = vector.multi_reduction <add>, %336, %cst_154 [1] : vector<16x32xf32> to vector<16xf32>
    %338 = vector.shape_cast %337 : vector<16xf32> to vector<16x1xf32>
    %cst_155 = arith.constant 3.200000e+01 : f32
    %339 = vector.broadcast %cst_155 : f32 to vector<16x1xf32>
    %340 = arith.divf %338, %339 : vector<16x1xf32>
    %cst_156 = arith.constant 9.99999996E-13 : f32
    %341 = vector.broadcast %cst_156 : f32 to vector<16x1xf32>
    %342 = arith.addf %340, %341 : vector<16x1xf32>
    %343 = math.rsqrt %342 : vector<16x1xf32>
    %344 = vector.broadcast %343 : vector<16x1xf32> to vector<16x32xf32>
    %345 = arith.mulf %335, %344 : vector<16x32xf32>
    %346 = vector.broadcast %327 : vector<1x32xf32> to vector<16x32xf32>
    %347 = arith.mulf %345, %346 : vector<16x32xf32>
    %348 = vector.broadcast %329 : vector<1x32xf32> to vector<16x32xf32>
    %349 = arith.addf %347, %348 : vector<16x32xf32>
    %c0_157 = arith.constant 0 : index
    %c0_158 = arith.constant 0 : index
    %350 = vector.load %arg18[%c0_157, %c0_158] : memref<16x32xf32, #tpu.memory_space<vmem>>, vector<16x32xf32>
    tpu.vector_store %arg18[%c0_157, %c0_158], %349 {strides = array<i32>} : memref<16x32xf32, #tpu.memory_space<vmem>>, vector<16x32xf32>,
    return
  }
}

</mosaic_0001>

<bundles_post_ra>
// kernel: claim_encoder_forward.1
= control target key start
LH: loop header
LB: loop body
LE: loop exit
PB: predicated region body
PF: predicated region fallthrough
CT: control target
= control target key end

     0   :  { %v67_v0 = vlaneseq  ;;  %v2635_v2 = vmov 1966171168   ;;  %v2636_v6 = vmov 0.0   ;;  %vm117_vm1 = vcmask 523264   ;;  %s2639_s30 = smov 96   ;;  %s2640_s25 = smov 16   ;;  %s3154_s0 = inlined_call_operand.vmem [shape: s32[2,8], index: 0, kind: input, shape index: {}]   ;;  %s3155_s1 = inlined_call_operand.vmem [shape: f32[64,32], index: 1, kind: input, shape index: {}]   ;;  %s3156_s2 = inlined_call_operand.vmem [shape: f32[16,32], index: 2, kind: input, shape index: {}]   ;;  %s3157_s3 = inlined_call_operand.vmem [shape: f32[2,32], index: 3, kind: input, shape index: {}]   ;;  %s3158_s6 = inlined_call_operand.vmem [shape: bf16[4,32,48], index: 6, kind: input, shape index: {}]   ;;  %s3159_s4 = inlined_call_operand.vmem [shape: f32[1,32], index: 4, kind: input, shape index: {}]   ;;  %s3160_s5 = inlined_call_operand.vmem [shape: f32[1,32], index: 5, kind: input, shape index: {}]   ;;  %s3161_s7 = inlined_call_operand.vmem [shape: f32[4,1,48], index: 7, kind: input, shape index: {}]   ;;  %s3162_s8 = inlined_call_operand.vmem [shape: bf16[2,32,32], index: 8, kind: input, shape index: {}]   ;;  %s3163_s9 = inlined_call_operand.vmem [shape: f32[2,1,32], index: 9, kind: input, shape index: {}]   ;;  %s3164_s12 = inlined_call_operand.vmem [shape: bf16[2,32,64], index: 12, kind: input, shape index: {}]   ;;  %s3165_s10 = inlined_call_operand.vmem [shape: f32[2,1,32], index: 10, kind: input, shape index: {}]   ;;  %s3166_s11 = inlined_call_operand.vmem [shape: f32[2,1,32], index: 11, kind: input, shape index: {}]   ;;  %s3167_s14 = inlined_call_operand.vmem [shape: bf16[2,64,32], index: 14, kind: input, shape index: {}]   ;;  %s3168_s13 = inlined_call_operand.vmem [shape: f32[2,1,64], index: 13, kind: input, shape index: {}]   ;;  %s3169_s15 = inlined_call_operand.vmem [shape: f32[2,1,32], index: 15, kind: input, shape index: {}]   ;;  %s3170_s16 = inlined_call_operand.vmem [shape: f32[2,1,32], index: 16, kind: input, shape index: {}]   ;;  %s3171_s17 = inlined_call_operand.vmem [shape: f32[2,1,32], index: 17, kind: input, shape index: {}]   ;;  %s3172_s18 = inlined_call_operand.vmem [shape: f32[16,32], index: 18, kind: output, shape index: {}]  }
   0x1   :  { %3174 = sst [smem:[#allocation2_spill]] %s3154_s0  ;;  %v65_v3 = vunpack.c.l.s4 %v2635_v2  ;;  %2335 = vmatprep.subr.bf16.mxu1 %v2636_v6  ;;  %v2131_v39 = vld [vmem:[%s3157_s3] ss:$0 sm:$0xff]  ;;  %vm208_vm4 = vcmask 261120   ;;  %v2552_v57 = vld [vmem:[%s3158_s6 + $0x8] sm:$0xff]   ;;  %vm2637_vm5 = vmmov 0  }
   0x2   :  { %3175 = sst [smem:[#allocation3_spill]] %s3155_s1  ;;  %s3177_s29 = sld [smem:[#allocation2_spill]]  ;;  %v68_v7 = vshrl.u32 %v67_v0, 7  ;;  %v101_v31 = vand.u32 127, %v67_v0  ;;  %v2551_v56 = vld [vmem:[%s3158_s6] sm:$0xff]   ;;  %2339 = vmatprep.mubr.msk.bf16.mxu1 %vm2637_vm5, %v2636_v6  ;;  %vm325_vm6 = vcmask 130048  }
   0x3   :  { %3176 = sst [smem:[#allocation4_spill]] %s3156_s2  ;;  %s3178_s19 = sld [smem:[#allocation3_spill]]  ;;  %v66_v11 = vunpack.c.0.s8 %v65_v3  ;;  %2336 = vmatpush3.bf16.msra.mxu1 %v2551_v56  ;;  %v2132_v2 = vld [vmem:[%s3159_s4] ss:$0 sm:$0xff]  ;;  %vm435_vm7 = vcmask 64512   ;;  %vm465_vm8 = vcmask 1043456  }
   0x4   :  { %v88_v15 = vsub.s32 0, %v68_v7  ;;  %v95_v17 = vsub.s32 1, %v68_v7  ;;  %s3179_s20 = sld [smem:[#allocation4_spill]]  ;;  %2337 = vmatprep.subr.bf16.mxu1 %v2636_v6 }
   0x5   :  { %v69_v18 = vsub.s32 %v66_v11, %v68_v7  ;;  %v2133_v7 = vld [vmem:[%s3160_s5] ss:$0 sm:$0xff]  ;;  %s2638_s5 = smov 112  }
   0x7   :  { %2338 = vmatpush3.bf16.msra.mxu1 %v2552_v57 }
   0x8   :  { %v60_v1 = vld [vmem:[%s3177_s29] sm:$0x3]  ;;  %2343 = vmatprep.subr.bf16.mxu1 %v2636_v6 }
   0x9   :  { %v108_v4 = vld [vmem:[%s3178_s19] sm:$0xff]  ;;  %v109_v5 = vld [vmem:[%s3178_s19 + $0x8] sm:$0xff]  ;;  %vm61_vm0 = vcmp.eq.s32.totalorder %v60_v1, 0  ;;  %v110_v9 = vld [vmem:[%s3178_s19 + $0x10] sm:$0xff]  ;;  %v89_v19 = vrot.slane %v60_v1, %v88_v15  ;;  %v96_v24 = vrot.slane %v60_v1, %v95_v17 }
   0xa   :  { %v2519_v8 = vpack.c.bf16 %v109_v5, %v108_v4  ;;  %v111_v10 = vld [vmem:[%s3178_s19 + $0x18] sm:$0xff]  ;;  %v112_v13 = vld [vmem:[%s3178_s19 + $0x20] sm:$0xff]  ;;  %v113_v14 = vld [vmem:[%s3178_s19 + $0x28] sm:$0xff]  ;;  %v62_v16 = vsel %vm61_vm0, -1e+09, %v2636_v6 }
   0xb   :  { %v2523_v12 = vpack.c.bf16 %v111_v10, %v110_v9  ;;  %v2527_v20 = vpack.c.bf16 %v113_v14, %v112_v13  ;;  %v70_v21 = vrot.slane %v62_v16, %v69_v18  ;;  %v114_v22 = vld [vmem:[%s3178_s19 + $0x30] sm:$0xff]  ;;  %v115_v23 = vld [vmem:[%s3178_s19 + $0x38] sm:$0xff]  ;;  %91 = vbcast.lane.b32.xlu0 %v89_v19, 256  ;;  %v116_v36 = vld [vmem:[%s3179_s20] sm:$0xff] }
   0xc   :  { %2520 = vmatprep.subr.bf16.mxu0 %v2519_v8  ;;  %v2531_v27 = vpack.c.bf16 %v115_v23, %v114_v22 }
   0xd   :  { %2522 = vmatpush3.bf16.msra.mxu0 %v2519_v8  ;;  %v71_v25 = vcombine.high %v70_v21, %v70_v21  ;;  %v78_v26 = vrot.slane %v70_v21, %v69_v18 }
   0xe   :  { %2524 = vmatprep.subr.bf16.mxu0 %v2523_v12 }
   0xf   :  { %v85_v28 = vrot.slane %v71_v25, %v69_v18  ;;  %v2765_v29 = vrot.slane %v78_v26, %v88_v15  ;;  %98 = vbcast.lane.b32.xlu0 %v96_v24, 256 }
  0x11   :  { %2526 = vmatpush3.bf16.msra.mxu0 %v2523_v12  ;;  %v2767_v30 = vrot.slane %v85_v28, %v88_v15  ;;  %v2134_v12 = vld [vmem:[%s3161_s7] ss:$0 sm:$0xff] }
  0x12   :  { %2528 = vmatprep.subr.bf16.mxu0 %v2527_v20 }
  0x15   :  { %2530 = vmatpush3.bf16.msra.mxu0 %v2527_v20 }
  0x16   :  { %2532 = vmatprep.subr.bf16.mxu0 %v2531_v27 }
  0x19   :  { %2534 = vmatpush3.bf16.msra.mxu0 %v2531_v27 }
  0x1a   :  { %2361 = vmatprep.subr.bf16.mxu0 %v2636_v6 }
  0x7d   :  { %v92_v32 = vpop.permute.xlu0 %91 }
  0x7e   :  { %vm102_vm2 = vcmp.eq.s32.totalorder %v92_v32, %v101_v31 }
  0x7f   :  { %v2127_v33 = vsel %vm102_vm2, 1.0, %v2636_v6 }
  0x80   :  { %2332 = vmatprep.mubr.msk.f32.mxu0 %vm117_vm1, %v2127_v33 }
  0x81   :  { %v99_v34 = vpop.permute.xlu0 %98 }
  0x82   :  { %vm103_vm3 = vcmp.eq.s32.totalorder %v99_v34, %v101_v31 }
  0x83   :  { %v2128_v35 = vsel %vm103_vm3, 1.0, %v2636_v6 }
  0x84   :  { %2333 = vmatmul.mubr.msk.f32.vlgmr.msra.gmra.mrb[0].mxu0 %vm117_vm1, %v2128_v35 }
  0x85   :  { %2363 = vmatprep.mubr.msk.bf16.mxu0 %vm2637_vm5, %v2636_v6 }
 0x157   :  { %v2334_v37 = vpop.f32.mrb[0].mxu0 }
 0x158   :  { %v190_v38 = vpop.f32.mrb[1].mxu0  ;;  %v196_v40 = vadd.f32 %v2334_v37, %v116_v36 }
 0x159   :  { %v191_v41 = vadd.f32 %v190_v38, %v116_v36 }
 0x15a   :  { %v205_v44 = vadd.f32 %v2131_v39, %v196_v40 }
 0x15b   :  { %v204_v42 = vadd.f32 %v2131_v39, %v191_v41 }
 0x15c   :  { %v212_v45 = vsel %vm208_vm4, %v205_v44, 0.0 }
 0x15d   :  { %v209_v43 = vsel %vm208_vm4, %v204_v42, 0.0 }
 0x15e   :  { %210 = vadd.xlane.f32.xlu1 %v209_v43 }
 0x162   :  { %213 = vadd.xlane.f32.xlu1 %v212_v45 }
 0x1eb   :  { %v211_v46 = vpop.xlane.xlu1 %210 }
 0x1ec   :  { %v216_v47 = vmul.f32 0.03125, %v211_v46 }
 0x1ee   :  { %v218_v48 = vsub.f32 %v204_v42, %v216_v47 }
 0x1ef   :  { %v214_v49 = vpop.xlane.xlu1 %213 }
 0x1f0   :  { %v217_v50 = vmul.f32 0.03125, %v214_v49  ;;  %v220_v51 = vmul.f32 %v218_v48, %v218_v48 }
 0x1f2   :  { %v219_v52 = vsub.f32 %v205_v44, %v217_v50  ;;  %v222_v53 = vsel %vm208_vm4, %v220_v51, 0.0 }
 0x1f3   :  { %223 = vadd.xlane.f32.xlu0 %v222_v53 }
 0x1f4   :  { %v221_v54 = vmul.f32 %v219_v52, %v219_v52 }
 0x1f6   :  { %v225_v55 = vsel %vm208_vm4, %v221_v54, 0.0 }
 0x1f7   :  { %226 = vadd.xlane.f32.xlu1 %v225_v55 }
 0x280   :  { %v224_v58 = vpop.xlane.xlu0 %223 }
 0x281   :  { %v228_v59 = vmul.f32 0.03125, %v224_v58  ;;  %v2553_v58 = vld [vmem:[%s3158_s6 + $0x10] sm:$0xff]  }
 0x283   :  { %v230_v60 = vadd.f32 1e-12, %v228_v59 }
 0x284   :  { %v227_v61 = vpop.xlane.xlu1 %226 }
 0x285   :  { %2575 = vrsqrt.f32 %v230_v60  ;;  %v229_v62 = vmul.f32 0.03125, %v227_v61  ;;  %v2554_v60 = vld [vmem:[%s3158_s6 + $0x18] sm:$0xff]  }
 0x287   :  { %v231_v63 = vadd.f32 1e-12, %v229_v62 }
 0x289   :  { %2577 = vrsqrt.f32 %v231_v63 }
 0x28f   :  { %v2576_v0 = vpop.eup %2575 }
 0x290   :  { %v234_v1 = vmul.f32 %v2576_v0, %v218_v48 }
 0x292   :  { %v242_v5 = vmul.f32 %v2132_v2, %v234_v1 }
 0x293   :  { %v2578_v3 = vpop.eup %2577 }
 0x294   :  { %v235_v4 = vmul.f32 %v2578_v3, %v219_v52  ;;  %v2802_v9 = vadd.f32 %v2133_v7, %v242_v5  ;;  %v2147_v5 = vld [vmem:[%s3161_s7 + $0x1] ss:$0 sm:$0xff] }
 0x296   :  { %v243_v8 = vmul.f32 %v2132_v2, %v235_v4 }
 0x298   :  { %v2804_v10 = vadd.f32 %v2133_v7, %v243_v8 }
 0x29a   :  { %v2808_v11 = vpack.c.bf16 %v2804_v10, %v2802_v9 }
 0x29c   :  { %2340 = vmatmul.mubr.msk.bf16.vlgmr.msra.gmra.mrb[0].mxu1 %vm208_vm4, %v2808_v11 }
 0x29d   :  { %2345 = vmatprep.mubr.msk.bf16.mxu1 %vm2637_vm5, %v2636_v6 }
 0x36f   :  { %v313_v13 = vpop.f32.mrb[0].mxu1 }
 0x370   :  { %v314_v14 = vadd.f32 %v2134_v12, %v313_v13  ;;  %v2341_v15 = vpop.f32.mrb[1].mxu1 }
 0x371   :  { %v316_v16 = vpop.f32.mrb[2].mxu1 }
 0x372   :  { %v320_v17 = vpack.c.bf16 %v314_v14, %v314_v14  ;;  %v317_v18 = vadd.f32 %v2134_v12, %v316_v16  ;;  %v2342_v19 = vpop.f32.mrb[3].mxu1 }
 0x374   :  { %v321_v20 = vpack.c.bf16 %v317_v18, %v317_v18  ;;  %323 = vrot.lane.b32.xlu1 %v320_v17, %s2638_s5 }
 0x376   :  { %373 = vrot.lane.b32.xlu0 %v321_v20, %s2638_s5 }
 0x3e6   :  { %v324_v21 = vpop.permute.xlu1 %323 }
 0x3e7   :  { %v330_v22 = vsel %vm325_vm6, %v324_v21, 0 }
 0x3e8   :  { %2344 = vmatpush3.bf16.xpose.msra.mxu1 %v330_v22  ;;  %v374_v23 = vpop.permute.xlu0 %373 }
 0x3e9   :  { %2349 = vmatprep.subr.bf16.mxu1 %v2636_v6  ;;  %v379_v24 = vsel %vm325_vm6, %v374_v23, 0 }
 0x3ef   :  { %2346 = vmatmul.mubr.msk.bf16.vlgmr.msra.gmra.mrb[4].mxu1 %vm325_vm6, %v320_v17 }
 0x3f0   :  { %2350 = vmatpush3.bf16.xpose.msra.mxu1 %v379_v24  ;;  %2351 = vmatprep.mubr.msk.bf16.mxu1 %vm2637_vm5, %v2636_v6 }
 0x3f1   :  { %2355 = vmatprep.subr.bf16.mxu1 %v2636_v6 }
 0x3f7   :  { %2352 = vmatmul.mubr.msk.bf16.vlgmr.msra.gmra.mrb[8].mxu1 %vm325_vm6, %v321_v20 }
 0x3f8   :  { %2357 = vmatprep.mubr.msk.bf16.mxu1 %vm2637_vm5, %v2636_v6 }
 0x4c2   :  { %v366_v25 = vpop.f32.mrb[4].mxu1 }
 0x4c3   :  { %v421_v26 = vmul.f32 0.25, %v366_v25  ;;  %v2347_v27 = vpop.f32.mrb[5].mxu1 }
 0x4c4   :  { %v369_v28 = vpop.f32.mrb[6].mxu1 }
 0x4c5   :  { %v2348_v31 = vpop.f32.mrb[7].mxu1  ;;  %v433_v32 = vadd.f32 %v2765_v29, %v421_v26 }
 0x4c7   :  { %v436_v33 = vsel %vm435_vm7, %v433_v32, -inf }
 0x4c8   :  { %437 = vmax.xlane.f32.xlu1 %v436_v33 }
 0x4ca   :  { %v415_v34 = vpop.f32.mrb[8].mxu1 }
 0x4cb   :  { %v2353_v35 = vpop.f32.mrb[9].mxu1  ;;  %v422_v38 = vmul.f32 0.25, %v415_v34 }
 0x4cc   :  { %v418_v36 = vpop.f32.mrb[10].mxu1 }
 0x4cd   :  { %v2354_v37 = vpop.f32.mrb[11].mxu1  ;;  %v434_v39 = vadd.f32 %v2767_v30, %v422_v38 }
 0x4cf   :  { %v439_v40 = vsel %vm435_vm7, %v434_v39, -inf }
 0x4d9   :  { %460 = vrot.lane.b32.xlu1 %v320_v17, %s2639_s30 }
 0x4fd   :  { %440 = vmax.xlane.f32.xlu1 %v439_v40 }
 0x555   :  { %v438_v41 = vpop.xlane.xlu1 %437 }
 0x556   :  { %v442_v42 = vsub.f32 %v433_v32, %v438_v41 }
 0x558   :  { %v444_v43 = vmul.f32 1.442695, %v442_v42 }
 0x559   :  { %v461_v44 = vpop.permute.xlu1 %460 }
 0x55a   :  { %2579 = vpow2.f32 %v444_v43  ;;  %v467_v45 = vsel %vm465_vm8, %v461_v44, 0 }
 0x55b   :  { %2356 = vmatpush3.bf16.msra.mxu1 %v467_v45 }
 0x55c   :  { %2367 = vmatprep.subr.bf16.mxu1 %v2636_v6 }
 0x564   :  { %v2580_v46 = vpop.eup %2579 }
 0x565   :  { %v448_v47 = vsel %vm435_vm7, %v2580_v46, 0.0 }
 0x566   :  { %449 = vadd.xlane.f32.xlu0 %v448_v47 }
 0x57c   :  { %509 = vrot.lane.b32.xlu0 %v321_v20, %s2639_s30 }
 0x58a   :  { %v441_v48 = vpop.xlane.xlu1 %440 }
 0x58b   :  { %v443_v49 = vsub.f32 %v434_v39, %v441_v48 }
 0x58d   :  { %v446_v50 = vmul.f32 1.442695, %v443_v49 }
 0x58f   :  { %2581 = vpow2.f32 %v446_v50 }
 0x599   :  { %v2582_v51 = vpop.eup %2581 }
 0x59a   :  { %v451_v52 = vsel %vm435_vm7, %v2582_v51, 0.0 }
 0x59b   :  { %452 = vadd.xlane.f32.xlu0 %v451_v52 }
 0x5f3   :  { %v450_v53 = vpop.xlane.xlu0 %449 }
 0x5f4   :  { %2583 = vrcp.f32 %v450_v53 }
 0x5f7   :  { %v510_v54 = vpop.permute.xlu0 %509 }
 0x5f8   :  { %v515_v55 = vsel %vm465_vm8, %v510_v54, 0 }
 0x5f9   :  { %2362 = vmatpush3.bf16.msra.mxu0 %v515_v55 }
 0x5fa   :  { %2375 = vmatprep.subr.bf16.mxu0 %v2636_v6 }
 0x5fe   :  { %v2584_v56 = vpop.eup %2583 }
 0x5ff   :  { %v456_v57 = vmul.f32 %v2584_v56, %v2580_v46 }
 0x601   :  { %v458_v59 = vpack.c.bf16 %v456_v57, %v456_v57 }
 0x603   :  { %2358 = vmatmul.mubr.msk.bf16.vlgmr.msra.gmra.mrb[12].mxu1 %vm435_vm7, %v458_v59 }
 0x604   :  { %2368 = vmatpush3.bf16.msra.mxu1 %v2553_v58  ;;  %2371 = vmatprep.mubr.msk.bf16.mxu1 %vm2637_vm5, %v2636_v6 }
 0x605   :  { %2369 = vmatprep.subr.bf16.mxu1 %v2636_v6 }
 0x608   :  { %2370 = vmatpush3.bf16.msra.mxu1 %v2554_v60 }
 0x609   :  { %2381 = vmatprep.subr.bf16.mxu1 %v2636_v6 }
 0x60b   :  { %2372 = vmatmul.mubr.msk.bf16.vlgmr.msra.gmra.mrb[16].mxu1 %vm208_vm4, %v2808_v11 }
 0x60c   :  { %2383 = vmatprep.mubr.msk.bf16.mxu1 %vm2637_vm5, %v2636_v6 }
 0x628   :  { %v453_v61 = vpop.xlane.xlu0 %452 }
 0x629   :  { %2585 = vrcp.f32 %v453_v61 }
 0x633   :  { %v2586_v62 = vpop.eup %2585 }
 0x634   :  { %v457_v63 = vmul.f32 %v2586_v62, %v2582_v51 }
 0x636   :  { %v459_v0 = vpack.c.bf16 %v457_v63, %v457_v63  ;;  %v2555_v63 = vld [vmem:[%s3162_s8] sm:$0xff]  }
 0x638   :  { %2364 = vmatmul.mubr.msk.bf16.vlgmr.msra.gmra.mrb[4].mxu0 %vm435_vm7, %v459_v0  ;;  %v2556_v0 = vld [vmem:[%s3162_s8 + $0x8] sm:$0xff]  }
 0x639   :  { %2377 = vmatprep.mubr.msk.bf16.mxu0 %vm2637_vm5, %v2636_v6 }
 0x6d6   :  { %v2859_v1 = vpop.f32.mrb[12].mxu1 }
 0x6d7   :  { %v2359_v2 = vpop.f32.mrb[13].mxu1 }
 0x6d8   :  { %v506_v3 = vpop.f32.mrb[14].mxu1 }
 0x6d9   :  { %v2360_v4 = vpop.f32.mrb[15].mxu1 }
 0x6de   :  { %v616_v7 = vpop.f32.mrb[16].mxu1 }
 0x6df   :  { %v617_v8 = vadd.f32 %v2147_v5, %v616_v7  ;;  %v2373_v11 = vpop.f32.mrb[17].mxu1 }
 0x6e0   :  { %v619_v12 = vpop.f32.mrb[18].mxu1 }
 0x6e1   :  { %v623_v13 = vpack.c.bf16 %v617_v8, %v617_v8  ;;  %v620_v14 = vadd.f32 %v2147_v5, %v619_v12  ;;  %v2374_v15 = vpop.f32.mrb[19].mxu1 }
 0x6e3   :  { %v624_v16 = vpack.c.bf16 %v620_v14, %v620_v14  ;;  %626 = vrot.lane.b32.xlu0 %v623_v13, %s2638_s5 }
 0x6e5   :  { %675 = vrot.lane.b32.xlu1 %v624_v16, %s2638_s5 }
 0x70b   :  { %v2866_v17 = vpop.f32.mrb[4].mxu0 }
 0x70c   :  { %v2365_v18 = vpop.f32.mrb[5].mxu0 }
 0x70d   :  { %v554_v19 = vpop.f32.mrb[6].mxu0 }
 0x70e   :  { %v2366_v20 = vpop.f32.mrb[7].mxu0 }
 0x755   :  { %v627_v21 = vpop.permute.xlu0 %626 }
 0x756   :  { %v632_v22 = vsel %vm325_vm6, %v627_v21, 0  ;;  %v2155_v21 = vld [vmem:[%s3163_s9] ss:$0 sm:$0xff] }
 0x757   :  { %2376 = vmatpush3.bf16.xpose.msra.mxu0 %v632_v22  ;;  %v676_v23 = vpop.permute.xlu1 %675 }
 0x758   :  { %v681_v24 = vsel %vm325_vm6, %v676_v23, 0  ;;  %2387 = vmatprep.subr.bf16.mxu0 %v2636_v6 }
 0x759   :  { %2382 = vmatpush3.bf16.xpose.msra.mxu1 %v681_v24 }
 0x75a   :  { %2393 = vmatprep.subr.bf16.mxu1 %v2636_v6 }
 0x75e   :  { %2378 = vmatmul.mubr.msk.bf16.vlgmr.msra.gmra.mrb[8].mxu0 %vm325_vm6, %v623_v13 }
 0x75f   :  { %2389 = vmatprep.mubr.msk.bf16.mxu0 %vm2637_vm5, %v2636_v6 }
 0x760   :  { %2384 = vmatmul.mubr.msk.bf16.vlgmr.msra.gmra.mrb[20].mxu1 %vm325_vm6, %v624_v16 }
 0x761   :  { %2395 = vmatprep.mubr.msk.bf16.mxu1 %vm2637_vm5, %v2636_v6 }
 0x831   :  { %v668_v25 = vpop.f32.mrb[8].mxu0 }
 0x832   :  { %v723_v26 = vmul.f32 0.25, %v668_v25  ;;  %v2379_v27 = vpop.f32.mrb[9].mxu0 }
 0x833   :  { %v671_v28 = vpop.f32.mrb[10].mxu0  ;;  %v717_v31 = vpop.f32.mrb[20].mxu1 }
 0x834   :  { %v724_v32 = vmul.f32 0.25, %v717_v31  ;;  %v2380_v33 = vpop.f32.mrb[11].mxu0  ;;  %v2385_v34 = vpop.f32.mrb[21].mxu1  ;;  %v725_v35 = vadd.f32 %v723_v26, %v2765_v29 }
 0x835   :  { %v720_v36 = vpop.f32.mrb[22].mxu1 }
 0x836   :  { %v2386_v37 = vpop.f32.mrb[23].mxu1  ;;  %v727_v38 = vsel %vm435_vm7, %v725_v35, -inf  ;;  %v726_v39 = vadd.f32 %v724_v32, %v2767_v30 }
 0x837   :  { %728 = vmax.xlane.f32.xlu0 %v727_v38 }
 0x838   :  { %v730_v40 = vsel %vm435_vm7, %v726_v39, -inf }
 0x839   :  { %731 = vmax.xlane.f32.xlu1 %v730_v40 }
 0x84a   :  { %799 = vrot.lane.b32.xlu1 %v624_v16, %s2639_s30 }
 0x8c4   :  { %v729_v41 = vpop.xlane.xlu0 %728 }
 0x8c5   :  { %v733_v42 = vsub.f32 %v725_v35, %v729_v41  ;;  %v2558_v41 = vld [vmem:[%s3164_s12 + $0x8] sm:$0xff]  }
 0x8c6   :  { %v732_v43 = vpop.xlane.xlu1 %731 }
 0x8c7   :  { %v735_v44 = vmul.f32 1.442695, %v733_v42  ;;  %v734_v45 = vsub.f32 %v726_v39, %v732_v43 }
 0x8c9   :  { %2587 = vpow2.f32 %v735_v44  ;;  %v737_v46 = vmul.f32 1.442695, %v734_v45 }
 0x8ca   :  { %v800_v47 = vpop.permute.xlu1 %799 }
 0x8cb   :  { %2589 = vpow2.f32 %v737_v46  ;;  %v805_v48 = vsel %vm465_vm8, %v800_v47, 0 }
 0x8cc   :  { %2394 = vmatpush3.bf16.msra.mxu1 %v805_v48 }
 0x8cd   :  { %2407 = vmatprep.subr.bf16.mxu1 %v2636_v6 }
 0x8d3   :  { %v2588_v49 = vpop.eup %2587 }
 0x8d4   :  { %v739_v50 = vsel %vm435_vm7, %v2588_v49, 0.0 }
 0x8d5   :  { %v2590_v51 = vpop.eup %2589  ;;  %740 = vadd.xlane.f32.xlu0 %v739_v50  ;;  %v2159_v50 = vld [vmem:[%s3165_s10] ss:$0 sm:$0xff] }
 0x8d6   :  { %v742_v52 = vsel %vm435_vm7, %v2590_v51, 0.0 }
 0x8d9   :  { %743 = vadd.xlane.f32.xlu0 %v742_v52 }
 0x8ef   :  { %751 = vrot.lane.b32.xlu0 %v623_v13, %s2639_s30 }
 0x962   :  { %v741_v53 = vpop.xlane.xlu0 %740 }
 0x963   :  { %2591 = vrcp.f32 %v741_v53 }
 0x966   :  { %v744_v54 = vpop.xlane.xlu0 %743 }
 0x967   :  { %2593 = vrcp.f32 %v744_v54  ;;  %v2160_v54 = vld [vmem:[%s3166_s11] ss:$0 sm:$0xff] }
 0x96a   :  { %v752_v55 = vpop.permute.xlu0 %751 }
 0x96b   :  { %v757_v56 = vsel %vm465_vm8, %v752_v55, 0 }
 0x96c   :  { %2388 = vmatpush3.bf16.msra.mxu0 %v757_v56 }
 0x96d   :  { %v2592_v57 = vpop.eup %2591  ;;  %2399 = vmatprep.subr.bf16.mxu0 %v2636_v6 }
 0x96e   :  { %v747_v58 = vmul.f32 %v2592_v57, %v2588_v49 }
 0x970   :  { %v749_v59 = vpack.c.bf16 %v747_v58, %v747_v58 }
 0x971   :  { %v2594_v60 = vpop.eup %2593 }
 0x972   :  { %v748_v61 = vmul.f32 %v2594_v60, %v2590_v51  ;;  %2390 = vmatmul.mubr.msk.bf16.vlgmr.msra.gmra.mrb[12].mxu0 %vm435_vm7, %v749_v59  ;;  %v2559_v59 = vld [vmem:[%s3167_s14] sm:$0xff]   ;;  %v2560_v60 = vld [vmem:[%s3167_s14 + $0x8] sm:$0xff]  }
 0x973   :  { %2403 = vmatprep.mubr.msk.bf16.mxu0 %vm2637_vm5, %v2636_v6  ;;  %2400 = vmatpush3.bf16.msra.mxu0 %v2555_v63  ;;  %v2161_v63 = vld [vmem:[%s3168_s13] ss:$0 sm:$0xff] }
 0x974   :  { %v750_v62 = vpack.c.bf16 %v748_v61, %v748_v61  ;;  %2401 = vmatprep.subr.bf16.mxu0 %v2636_v6  ;;  %v2561_v61 = vld [vmem:[%s3167_s14 + $0x10] sm:$0xff]  }
 0x976   :  { %2396 = vmatmul.mubr.msk.bf16.vlgmr.msra.gmra.mrb[24].mxu1 %vm435_vm7, %v750_v62  ;;  %v2562_v62 = vld [vmem:[%s3167_s14 + $0x18] sm:$0xff]  }
 0x977   :  { %2411 = vmatprep.mubr.msk.bf16.mxu1 %vm2637_vm5, %v2636_v6  ;;  %2402 = vmatpush3.bf16.msra.mxu0 %v2556_v0 }
 0x978   :  { %2415 = vmatprep.subr.bf16.mxu0 %v2636_v6 }
 0xa45   :  { %v793_v2 = vpop.f32.mrb[12].mxu0 }
 0xa46   :  { %v2391_v3 = vpop.f32.mrb[13].mxu0 }
 0xa47   :  { %v796_v4 = vpop.f32.mrb[14].mxu0 }
 0xa48   :  { %v2392_v5 = vpop.f32.mrb[15].mxu0 }
 0xa49   :  { %v841_v7 = vpop.f32.mrb[24].mxu1 }
 0xa4a   :  { %v2541_v8 = vpack.i.bf16 %v841_v7, %v793_v2  ;;  %v2397_v11 = vpop.f32.mrb[25].mxu1 }
 0xa4b   :  { %v844_v12 = vpop.f32.mrb[26].mxu1 }
 0xa4c   :  { %2542 = vrot.lane.b32.xlu0 %v2541_v8, %s2640_s25  ;;  %v2398_v13 = vpop.f32.mrb[27].mxu1 }
 0xabe   :  { %v2543_v14 = vpop.permute.xlu0 %2542 }
 0xabf   :  { %v2545_v15 = vunpack.i.h.bf16 %v2543_v14  ;;  %v2544_v16 = vunpack.i.l.bf16 %v2543_v14 }
 0xac1   :  { %v856_v18 = vsel %vm325_vm6, %v2866_v17, %v2545_v15  ;;  %v855_v19 = vsel %vm325_vm6, %v2859_v1, %v2544_v16 }
 0xac2   :  { %v857_v20 = vpack.c.bf16 %v856_v18, %v855_v19 }
 0xac4   :  { %2404 = vmatmul.mubr.msk.bf16.vlgmr.msra.gmra.mrb[16].mxu0 %vm208_vm4, %v857_v20 }
 0xac5   :  { %2423 = vmatprep.mubr.msk.bf16.mxu0 %vm2637_vm5, %v2636_v6  ;;  %2416 = vmatpush3.bf16.msra.mxu0 %v2559_v59 }
 0xac6   :  { %2417 = vmatprep.subr.bf16.mxu0 %v2636_v6 }
 0xac9   :  { %2418 = vmatpush3.bf16.msra.mxu0 %v2560_v60 }
 0xaca   :  { %2419 = vmatprep.subr.bf16.mxu0 %v2636_v6 }
 0xacd   :  { %2420 = vmatpush3.bf16.msra.mxu0 %v2561_v61 }
 0xace   :  { %2421 = vmatprep.subr.bf16.mxu0 %v2636_v6 }
 0xad1   :  { %2422 = vmatpush3.bf16.msra.mxu0 %v2562_v62 }
 0xad2   :  { %2441 = vmatprep.subr.bf16.mxu0 %v2636_v6 }
 0xb97   :  { %v918_v22 = vpop.f32.mrb[16].mxu0 }
 0xb98   :  { %v919_v23 = vadd.f32 %v2155_v21, %v918_v22  ;;  %v2405_v24 = vpop.f32.mrb[17].mxu0 }
 0xb99   :  { %v921_v25 = vpop.f32.mrb[18].mxu0 }
 0xb9a   :  { %v922_v26 = vadd.f32 %v2155_v21, %v921_v25  ;;  %v2406_v27 = vpop.f32.mrb[19].mxu0  ;;  %v925_v17 = vadd.f32 %v919_v23, %v2802_v9 }
 0xb9c   :  { %v929_v1 = vsel %vm208_vm4, %v925_v17, 0.0  ;;  %v926_v28 = vadd.f32 %v922_v26, %v2804_v10  ;;  %v2557_v10 = vld [vmem:[%s3164_s12] sm:$0xff]  }
 0xb9d   :  { %930 = vadd.xlane.f32.xlu0 %v929_v1  ;;  %2408 = vmatpush3.bf16.msra.mxu1 %v2557_v10 }
 0xb9e   :  { %v932_v31 = vsel %vm208_vm4, %v926_v28, 0.0  ;;  %2409 = vmatprep.subr.bf16.mxu1 %v2636_v6 }
 0xb9f   :  { %933 = vadd.xlane.f32.xlu1 %v932_v31 }
 0xba1   :  { %2410 = vmatpush3.bf16.msra.mxu1 %v2558_v41 }
 0xba2   :  { %2427 = vmatprep.subr.bf16.mxu1 %v2636_v6 }
 0xc2a   :  { %v931_v32 = vpop.xlane.xlu0 %930 }
 0xc2b   :  { %v935_v33 = vmul.f32 0.03125, %v931_v32 }
 0xc2c   :  { %v934_v34 = vpop.xlane.xlu1 %933 }
 0xc2d   :  { %v937_v35 = vsub.f32 %v925_v17, %v935_v33  ;;  %v936_v36 = vmul.f32 0.03125, %v934_v34 }
 0xc2f   :  { %v938_v37 = vsub.f32 %v926_v28, %v936_v36  ;;  %v939_v38 = vmul.f32 %v937_v35, %v937_v35  ;;  %v2165_v28 = vld [vmem:[%s3169_s15] ss:$0 sm:$0xff] }
 0xc31   :  { %v941_v39 = vsel %vm208_vm4, %v939_v38, 0.0  ;;  %v940_v40 = vmul.f32 %v938_v37, %v938_v37 }
 0xc32   :  { %942 = vadd.xlane.f32.xlu0 %v941_v39 }
 0xc33   :  { %v944_v9 = vsel %vm208_vm4, %v940_v40, 0.0 }
 0xc36   :  { %945 = vadd.xlane.f32.xlu0 %v944_v9 }
 0xcbf   :  { %v943_v42 = vpop.xlane.xlu0 %942 }
 0xcc0   :  { %v947_v43 = vmul.f32 0.03125, %v943_v42 }
 0xcc2   :  { %v949_v44 = vadd.f32 1e-12, %v947_v43 }
 0xcc3   :  { %v946_v45 = vpop.xlane.xlu0 %945 }
 0xcc4   :  { %2595 = vrsqrt.f32 %v949_v44  ;;  %v948_v46 = vmul.f32 0.03125, %v946_v45 }
 0xcc6   :  { %v950_v47 = vadd.f32 1e-12, %v948_v46 }
 0xcc8   :  { %2597 = vrsqrt.f32 %v950_v47 }
 0xcce   :  { %v2596_v48 = vpop.eup %2595 }
 0xccf   :  { %v953_v49 = vmul.f32 %v2596_v48, %v937_v35 }
 0xcd1   :  { %v961_v52 = vmul.f32 %v2159_v50, %v953_v49  ;;  %v2563_v49 = vld [vmem:[%s3158_s6 + $0x20] sm:$0xff]  }
 0xcd2   :  { %v2598_v51 = vpop.eup %2597 }
 0xcd3   :  { %v954_v53 = vmul.f32 %v2598_v51, %v938_v37  ;;  %v969_v56 = vadd.f32 %v2160_v54, %v961_v52 }
 0xcd5   :  { %v962_v55 = vmul.f32 %v2159_v50, %v954_v53  ;;  %v2564_v50 = vld [vmem:[%s3158_s6 + $0x28] sm:$0xff]  }
 0xcd7   :  { %v970_v57 = vadd.f32 %v2160_v54, %v962_v55 }
 0xcd9   :  { %v971_v58 = vpack.c.bf16 %v970_v57, %v969_v56 }
 0xcdb   :  { %2412 = vmatmul.mubr.msk.bf16.vlgmr.msra.gmra.mrb[28].mxu1 %vm208_vm4, %v971_v58  ;;  %v2171_v58 = vld [vmem:[%s3170_s16] ss:$0 sm:$0xff] }
 0xcdc   :  { %2431 = vmatprep.mubr.msk.bf16.mxu1 %vm2637_vm5, %v2636_v6  ;;  %2428 = vmatpush3.bf16.msra.mxu1 %v2563_v49 }
 0xcdd   :  { %2429 = vmatprep.subr.bf16.mxu1 %v2636_v6 }
 0xce0   :  { %2430 = vmatpush3.bf16.msra.mxu1 %v2564_v50 }
 0xce1   :  { %2435 = vmatprep.subr.bf16.mxu1 %v2636_v6 }
 0xdae   :  { %v1032_v0 = vpop.f32.mrb[28].mxu1 }
 0xdaf   :  { %v1033_v2 = vadd.f32 %v2161_v63, %v1032_v0  ;;  %v2413_v3 = vpop.f32.mrb[29].mxu1 }
 0xdb0   :  { %v1035_v4 = vpop.f32.mrb[30].mxu1 }
 0xdb1   :  { %v1041_v5 = vmul.f32 0.044715, %v1033_v2  ;;  %v1036_v7 = vadd.f32 %v2161_v63, %v1035_v4  ;;  %v2414_v8 = vpop.f32.mrb[31].mxu1  ;;  %v1039_v24 = vmul.f32 0.5, %v1033_v2  ;;  %v2172_v63 = vld [vmem:[%s3171_s17] ss:$0 sm:$0xff] }
 0xdb3   :  { %v1043_v11 = vmul.f32 %v1041_v5, %v1033_v2  ;;  %v1042_v12 = vmul.f32 0.044715, %v1036_v7  ;;  %v1040_v25 = vmul.f32 0.5, %v1036_v7  ;;  %v2178_v5 = vld [vmem:[%s3161_s7 + $0x2] ss:$0 sm:$0xff] }
 0xdb5   :  { %v1045_v13 = vmul.f32 %v1043_v11, %v1033_v2  ;;  %v1044_v14 = vmul.f32 %v1042_v12, %v1036_v7 }
 0xdb7   :  { %v1047_v15 = vadd.f32 %v1045_v13, %v1033_v2  ;;  %v1046_v16 = vmul.f32 %v1044_v14, %v1036_v7 }
 0xdb9   :  { %v1049_v18 = vmul.f32 0.7978846, %v1047_v15  ;;  %v1048_v19 = vadd.f32 %v1046_v16, %v1036_v7 }
 0xdbb   :  { %2599 = vtanh.f32 %v1049_v18  ;;  %v1050_v20 = vmul.f32 0.7978846, %v1048_v19 }
 0xdbd   :  { %2601 = vtanh.f32 %v1050_v20 }
 0xdc5   :  { %v2600_v21 = vpop.eup %2599 }
 0xdc6   :  { %v1053_v22 = vadd.f32 1.0, %v2600_v21 }
 0xdc7   :  { %v2602_v23 = vpop.eup %2601 }
 0xdc8   :  { %v1054_v26 = vadd.f32 1.0, %v2602_v23  ;;  %v1055_v27 = vmul.f32 %v1053_v22, %v1039_v24 }
 0xdca   :  { %v1056_v17 = vmul.f32 %v1054_v26, %v1040_v25 }
 0xdcc   :  { %v1057_v1 = vpack.c.bf16 %v1056_v17, %v1055_v27 }
 0xdce   :  { %2424 = vmatmul.mubr.msk.bf16.vlgmr.msra.gmra.mrb[20].mxu0 %vm117_vm1, %v1057_v1 }
 0xdcf   :  { %2443 = vmatprep.mubr.msk.bf16.mxu0 %vm2637_vm5, %v2636_v6 }
 0xea1   :  { %v1134_v31 = vpop.f32.mrb[20].mxu0 }
 0xea2   :  { %v1135_v32 = vadd.f32 %v2165_v28, %v1134_v31  ;;  %v2425_v33 = vpop.f32.mrb[21].mxu0 }
 0xea3   :  { %v1137_v34 = vpop.f32.mrb[22].mxu0 }
 0xea4   :  { %v1138_v35 = vadd.f32 %v2165_v28, %v1137_v34  ;;  %v2426_v36 = vpop.f32.mrb[23].mxu0  ;;  %v1141_v37 = vadd.f32 %v1135_v32, %v969_v56 }
 0xea6   :  { %v1145_v38 = vsel %vm208_vm4, %v1141_v37, 0.0  ;;  %v1142_v39 = vadd.f32 %v1138_v35, %v970_v57 }
 0xea7   :  { %1146 = vadd.xlane.f32.xlu1 %v1145_v38 }
 0xea8   :  { %v1148_v40 = vsel %vm208_vm4, %v1142_v39, 0.0 }
 0xea9   :  { %1149 = vadd.xlane.f32.xlu0 %v1148_v40 }
 0xf34   :  { %v1147_v9 = vpop.xlane.xlu1 %1146 }
 0xf35   :  { %v1151_v10 = vmul.f32 0.03125, %v1147_v9  ;;  %v2565_v9 = vld [vmem:[%s3158_s6 + $0x30] sm:$0xff]  }
 0xf36   :  { %v1150_v41 = vpop.xlane.xlu0 %1149 }
 0xf37   :  { %v1153_v42 = vsub.f32 %v1141_v37, %v1151_v10  ;;  %v1152_v43 = vmul.f32 0.03125, %v1150_v41  ;;  %v2566_v41 = vld [vmem:[%s3158_s6 + $0x38] sm:$0xff]  }
 0xf39   :  { %v1154_v44 = vsub.f32 %v1142_v39, %v1152_v43  ;;  %v1155_v45 = vmul.f32 %v1153_v42, %v1153_v42 }
 0xf3b   :  { %v1157_v46 = vsel %vm208_vm4, %v1155_v45, 0.0  ;;  %v1156_v47 = vmul.f32 %v1154_v44, %v1154_v44 }
 0xf3c   :  { %1158 = vadd.xlane.f32.xlu1 %v1157_v46 }
 0xf3d   :  { %v1160_v48 = vsel %vm208_vm4, %v1156_v47, 0.0 }
 0xf3e   :  { %1161 = vadd.xlane.f32.xlu0 %v1160_v48 }
 0xfc9   :  { %v1159_v51 = vpop.xlane.xlu1 %1158 }
 0xfca   :  { %v1163_v52 = vmul.f32 0.03125, %v1159_v51 }
 0xfcb   :  { %v1162_v53 = vpop.xlane.xlu0 %1161 }
 0xfcc   :  { %v1165_v54 = vadd.f32 1e-12, %v1163_v52  ;;  %v1164_v55 = vmul.f32 0.03125, %v1162_v53 }
 0xfce   :  { %2603 = vrsqrt.f32 %v1165_v54  ;;  %v1166_v56 = vadd.f32 1e-12, %v1164_v55 }
 0xfd0   :  { %2605 = vrsqrt.f32 %v1166_v56 }
 0xfd8   :  { %v2604_v57 = vpop.eup %2603 }
 0xfd9   :  { %v1169_v59 = vmul.f32 %v2604_v57, %v1153_v42 }
 0xfda   :  { %v2606_v60 = vpop.eup %2605 }
 0xfdb   :  { %v1177_v61 = vmul.f32 %v2171_v58, %v1169_v59  ;;  %v1170_v62 = vmul.f32 %v2606_v60, %v1154_v44 }
 0xfdd   :  { %v1178_v0 = vmul.f32 %v2171_v58, %v1170_v62  ;;  %v2981_v2 = vadd.f32 %v2172_v63, %v1177_v61  ;;  %v2191_v58 = vld [vmem:[%s3161_s7 + $0x3] ss:$0 sm:$0xff] }
 0xfdf   :  { %v2983_v3 = vadd.f32 %v2172_v63, %v1178_v0 }
 0xfe1   :  { %v2987_v4 = vpack.c.bf16 %v2983_v3, %v2981_v2 }
 0xfe3   :  { %2432 = vmatmul.mubr.msk.bf16.vlgmr.msra.gmra.mrb[32].mxu1 %vm208_vm4, %v2987_v4 }
 0xfe4   :  { %2437 = vmatprep.mubr.msk.bf16.mxu1 %vm2637_vm5, %v2636_v6 }
0x10b6   :  { %v1250_v7 = vpop.f32.mrb[32].mxu1 }
0x10b7   :  { %v1251_v8 = vadd.f32 %v2178_v5, %v1250_v7  ;;  %v2433_v11 = vpop.f32.mrb[33].mxu1 }
0x10b8   :  { %v1253_v12 = vpop.f32.mrb[34].mxu1 }
0x10b9   :  { %v1257_v13 = vpack.c.bf16 %v1251_v8, %v1251_v8  ;;  %v1254_v14 = vadd.f32 %v2178_v5, %v1253_v12  ;;  %v2434_v15 = vpop.f32.mrb[35].mxu1 }
0x10bb   :  { %1260 = vrot.lane.b32.xlu1 %v1257_v13, %s2638_s5  ;;  %v1258_v26 = vpack.c.bf16 %v1254_v14, %v1254_v14 }
0x112d   :  { %v1261_v16 = vpop.permute.xlu1 %1260 }
0x112e   :  { %v1266_v18 = vsel %vm325_vm6, %v1261_v16, 0 }
0x112f   :  { %2436 = vmatpush3.bf16.xpose.msra.mxu1 %v1266_v18 }
0x1130   :  { %2447 = vmatprep.subr.bf16.mxu1 %v2636_v6 }
0x1136   :  { %2438 = vmatmul.mubr.msk.bf16.vlgmr.msra.gmra.mrb[36].mxu1 %vm325_vm6, %v1257_v13 }
0x1137   :  { %2449 = vmatprep.mubr.msk.bf16.mxu1 %vm2637_vm5, %v2636_v6 }
0x1209   :  { %v1302_v19 = vpop.f32.mrb[36].mxu1 }
0x120a   :  { %v1357_v20 = vmul.f32 0.25, %v1302_v19  ;;  %v2439_v21 = vpop.f32.mrb[37].mxu1 }
0x120b   :  { %v1305_v22 = vpop.f32.mrb[38].mxu1 }
0x120c   :  { %v2440_v23 = vpop.f32.mrb[39].mxu1  ;;  %v1359_v24 = vadd.f32 %v1357_v20, %v2765_v29 }
0x120e   :  { %v1361_v25 = vsel %vm435_vm7, %v1359_v24, -inf }
0x120f   :  { %1362 = vmax.xlane.f32.xlu0 %v1361_v25 }
0x1225   :  { %1309 = vrot.lane.b32.xlu0 %v1258_v26, %s2638_s5 }
0x1229   :  { %1385 = vrot.lane.b32.xlu0 %v1257_v13, %s2639_s30 }
0x129c   :  { %v1363_v27 = vpop.xlane.xlu0 %1362 }
0x129d   :  { %v1367_v17 = vsub.f32 %v1359_v24, %v1363_v27 }
0x129f   :  { %v1369_v1 = vmul.f32 1.442695, %v1367_v17 }
0x12a0   :  { %v1310_v28 = vpop.permute.xlu0 %1309 }
0x12a1   :  { %2607 = vpow2.f32 %v1369_v1  ;;  %v1315_v31 = vsel %vm325_vm6, %v1310_v28, 0 }
0x12a2   :  { %2442 = vmatpush3.bf16.xpose.msra.mxu0 %v1315_v31 }
0x12a3   :  { %2453 = vmatprep.subr.bf16.mxu0 %v2636_v6 }
0x12a4   :  { %v1386_v32 = vpop.permute.xlu0 %1385 }
0x12a5   :  { %v1391_v33 = vsel %vm465_vm8, %v1386_v32, 0 }
0x12a6   :  { %2448 = vmatpush3.bf16.msra.mxu1 %v1391_v33 }
0x12a7   :  { %2459 = vmatprep.subr.bf16.mxu1 %v2636_v6 }
0x12a9   :  { %2444 = vmatmul.mubr.msk.bf16.vlgmr.msra.gmra.mrb[24].mxu0 %vm325_vm6, %v1258_v26 }
0x12aa   :  { %2455 = vmatprep.mubr.msk.bf16.mxu0 %vm2637_vm5, %v2636_v6 }
0x12ab   :  { %v2608_v34 = vpop.eup %2607 }
0x12ac   :  { %v1373_v35 = vsel %vm435_vm7, %v2608_v34, 0.0 }
0x12ad   :  { %1374 = vadd.xlane.f32.xlu1 %v1373_v35 }
0x12be   :  { %1433 = vrot.lane.b32.xlu1 %v1258_v26, %s2639_s30 }
0x133a   :  { %v1375_v36 = vpop.xlane.xlu1 %1374 }
0x133b   :  { %2609 = vrcp.f32 %v1375_v36 }
0x133e   :  { %v1434_v37 = vpop.permute.xlu1 %1433 }
0x133f   :  { %v1439_v38 = vsel %vm465_vm8, %v1434_v37, 0 }
0x1340   :  { %2454 = vmatpush3.bf16.msra.mxu0 %v1439_v38 }
0x1341   :  { %2467 = vmatprep.subr.bf16.mxu0 %v2636_v6 }
0x1345   :  { %v2610_v39 = vpop.eup %2609 }
0x1346   :  { %v1381_v40 = vmul.f32 %v2610_v39, %v2608_v34 }
0x1348   :  { %v1383_v10 = vpack.c.bf16 %v1381_v40, %v1381_v40 }
0x134a   :  { %2450 = vmatmul.mubr.msk.bf16.vlgmr.msra.gmra.mrb[40].mxu1 %vm435_vm7, %v1383_v10 }
0x134b   :  { %2460 = vmatpush3.bf16.msra.mxu1 %v2565_v9  ;;  %2463 = vmatprep.mubr.msk.bf16.mxu1 %vm2637_vm5, %v2636_v6 }
0x134c   :  { %2461 = vmatprep.subr.bf16.mxu1 %v2636_v6 }
0x134f   :  { %2462 = vmatpush3.bf16.msra.mxu1 %v2566_v41 }
0x1350   :  { %2473 = vmatprep.subr.bf16.mxu1 %v2636_v6 }
0x1352   :  { %2464 = vmatmul.mubr.msk.bf16.vlgmr.msra.gmra.mrb[44].mxu1 %vm208_vm4, %v2987_v4 }
0x1353   :  { %2475 = vmatprep.mubr.msk.bf16.mxu1 %vm2637_vm5, %v2636_v6 }
0x137c   :  { %v1351_v42 = vpop.f32.mrb[24].mxu0 }
0x137d   :  { %v1358_v43 = vmul.f32 0.25, %v1351_v42  ;;  %v2445_v44 = vpop.f32.mrb[25].mxu0 }
0x137e   :  { %v1354_v45 = vpop.f32.mrb[26].mxu0 }
0x137f   :  { %v2446_v46 = vpop.f32.mrb[27].mxu0  ;;  %v1360_v47 = vadd.f32 %v1358_v43, %v2767_v30 }
0x1381   :  { %v1364_v48 = vsel %vm435_vm7, %v1360_v47, -inf }
0x1382   :  { %1365 = vmax.xlane.f32.xlu0 %v1364_v48 }
0x140f   :  { %v1366_v49 = vpop.xlane.xlu0 %1365 }
0x1410   :  { %v1368_v50 = vsub.f32 %v1360_v47, %v1366_v49 }
0x1412   :  { %v1371_v51 = vmul.f32 1.442695, %v1368_v50 }
0x1414   :  { %2611 = vpow2.f32 %v1371_v51 }
0x141d   :  { %v3034_v52 = vpop.f32.mrb[40].mxu1 }
0x141e   :  { %v2612_v53 = vpop.eup %2611  ;;  %v2451_v54 = vpop.f32.mrb[41].mxu1 }
0x141f   :  { %v1430_v55 = vpop.f32.mrb[42].mxu1  ;;  %v1376_v56 = vsel %vm435_vm7, %v2612_v53, 0.0 }
0x1420   :  { %1377 = vadd.xlane.f32.xlu1 %v1376_v56  ;;  %v2452_v57 = vpop.f32.mrb[43].mxu1  ;;  %v2567_v55 = vld [vmem:[%s3162_s8 + $0x10] sm:$0xff]  }
0x1425   :  { %v1540_v59 = vpop.f32.mrb[44].mxu1 }
0x1426   :  { %v1541_v60 = vadd.f32 %v2191_v58, %v1540_v59  ;;  %v2465_v61 = vpop.f32.mrb[45].mxu1  ;;  %v2568_v59 = vld [vmem:[%s3162_s8 + $0x18] sm:$0xff]  }
0x1427   :  { %v1543_v62 = vpop.f32.mrb[46].mxu1 }
0x1428   :  { %v1547_v63 = vpack.c.bf16 %v1541_v60, %v1541_v60  ;;  %v2466_v0 = vpop.f32.mrb[47].mxu1  ;;  %v1544_v4 = vadd.f32 %v2191_v58, %v1543_v62 }
0x142a   :  { %1550 = vrot.lane.b32.xlu0 %v1547_v63, %s2638_s5  ;;  %v1548_v5 = vpack.c.bf16 %v1544_v4, %v1544_v4 }
0x1431   :  { %1599 = vrot.lane.b32.xlu1 %v1548_v5, %s2638_s5 }
0x149c   :  { %v1551_v14 = vpop.permute.xlu0 %1550 }
0x149d   :  { %v1556_v16 = vsel %vm325_vm6, %v1551_v14, 0  ;;  %v2204_v14 = vld [vmem:[%s3163_s9 + $0x1] ss:$0 sm:$0xff] }
0x14ad   :  { %v1378_v7 = vpop.xlane.xlu1 %1377 }
0x14ae   :  { %2613 = vrcp.f32 %v1378_v7 }
0x14b1   :  { %v1600_v8 = vpop.permute.xlu1 %1599 }
0x14b2   :  { %v1605_v11 = vsel %vm325_vm6, %v1600_v8, 0 }
0x14b3   :  { %2474 = vmatpush3.bf16.xpose.msra.mxu1 %v1605_v11 }
0x14b4   :  { %2485 = vmatprep.subr.bf16.mxu1 %v2636_v6 }
0x14b8   :  { %v2614_v12 = vpop.eup %2613 }
0x14b9   :  { %v1382_v13 = vmul.f32 %v2614_v12, %v2612_v53 }
0x14ba   :  { %2476 = vmatmul.mubr.msk.bf16.vlgmr.msra.gmra.mrb[48].mxu1 %vm325_vm6, %v1548_v5 }
0x14bb   :  { %v1384_v15 = vpack.c.bf16 %v1382_v13, %v1382_v13  ;;  %2487 = vmatprep.mubr.msk.bf16.mxu1 %vm2637_vm5, %v2636_v6 }
0x14bd   :  { %2456 = vmatmul.mubr.msk.bf16.vlgmr.msra.gmra.mrb[28].mxu0 %vm435_vm7, %v1384_v15 }
0x14be   :  { %2468 = vmatpush3.bf16.xpose.msra.mxu0 %v1556_v16  ;;  %2469 = vmatprep.mubr.msk.bf16.mxu0 %vm2637_vm5, %v2636_v6 }
0x14bf   :  { %2479 = vmatprep.subr.bf16.mxu0 %v2636_v6 }
0x14c5   :  { %2470 = vmatmul.mubr.msk.bf16.vlgmr.msra.gmra.mrb[32].mxu0 %vm325_vm6, %v1547_v63 }
0x14c6   :  { %2481 = vmatprep.mubr.msk.bf16.mxu0 %vm2637_vm5, %v2636_v6 }
0x158d   :  { %v1641_v18 = vpop.f32.mrb[48].mxu1 }
0x158e   :  { %v1648_v19 = vmul.f32 0.25, %v1641_v18  ;;  %v2477_v20 = vpop.f32.mrb[49].mxu1 }
0x158f   :  { %v1644_v21 = vpop.f32.mrb[50].mxu1 }
0x1590   :  { %v3055_v22 = vpop.f32.mrb[28].mxu0  ;;  %v2478_v23 = vpop.f32.mrb[51].mxu1  ;;  %v1650_v24 = vadd.f32 %v1648_v19, %v2767_v30 }
0x1591   :  { %v2457_v25 = vpop.f32.mrb[29].mxu0 }
0x1592   :  { %v1478_v26 = vpop.f32.mrb[30].mxu0  ;;  %v1654_v27 = vsel %vm435_vm7, %v1650_v24, -inf }
0x1593   :  { %v2458_v17 = vpop.f32.mrb[31].mxu0  ;;  %1655 = vmax.xlane.f32.xlu0 %v1654_v27 }
0x1598   :  { %v1592_v1 = vpop.f32.mrb[32].mxu0 }
0x1599   :  { %v1647_v28 = vmul.f32 0.25, %v1592_v1  ;;  %v2471_v31 = vpop.f32.mrb[33].mxu0 }
0x159a   :  { %v1595_v32 = vpop.f32.mrb[34].mxu0 }
0x159b   :  { %v2472_v33 = vpop.f32.mrb[35].mxu0  ;;  %v1649_v34 = vadd.f32 %v1647_v28, %v2765_v29 }
0x159d   :  { %v1651_v35 = vsel %vm435_vm7, %v1649_v34, -inf }
0x159e   :  { %1652 = vmax.xlane.f32.xlu1 %v1651_v35 }
0x1620   :  { %v1656_v36 = vpop.xlane.xlu0 %1655 }
0x1621   :  { %v1658_v37 = vsub.f32 %v1650_v24, %v1656_v36 }
0x1623   :  { %v1661_v38 = vmul.f32 1.442695, %v1658_v37 }
0x1625   :  { %2615 = vpow2.f32 %v1661_v38 }
0x162b   :  { %v1653_v30 = vpop.xlane.xlu1 %1652 }
0x162c   :  { %v1657_v39 = vsub.f32 %v1649_v34, %v1653_v30  ;;  %v2570_v34 = vld [vmem:[%s3164_s12 + $0x18] sm:$0xff]  }
0x162e   :  { %v1659_v40 = vmul.f32 1.442695, %v1657_v39 }
0x162f   :  { %v2616_v9 = vpop.eup %2615 }
0x1630   :  { %2617 = vpow2.f32 %v1659_v40  ;;  %v1666_v10 = vsel %vm435_vm7, %v2616_v9, 0.0 }
0x1631   :  { %1667 = vadd.xlane.f32.xlu0 %v1666_v10 }
0x163a   :  { %v2618_v41 = vpop.eup %2617 }
0x163b   :  { %v1663_v42 = vsel %vm435_vm7, %v2618_v41, 0.0 }
0x163c   :  { %1664 = vadd.xlane.f32.xlu1 %v1663_v42 }
0x1647   :  { %1723 = vrot.lane.b32.xlu0 %v1548_v5, %s2639_s30 }
0x164d   :  { %1675 = vrot.lane.b32.xlu1 %v1547_v63, %s2639_s30 }
0x16be   :  { %v1668_v29 = vpop.xlane.xlu0 %1667 }
0x16bf   :  { %2619 = vrcp.f32 %v1668_v29 }
0x16c2   :  { %v1724_v43 = vpop.permute.xlu0 %1723 }
0x16c3   :  { %v1729_v44 = vsel %vm465_vm8, %v1724_v43, 0  ;;  %v2211_v43 = vld [vmem:[%s3166_s11 + $0x1] ss:$0 sm:$0xff] }
0x16c4   :  { %2486 = vmatpush3.bf16.msra.mxu1 %v1729_v44 }
0x16c5   :  { %2499 = vmatprep.subr.bf16.mxu1 %v2636_v6 }
0x16c9   :  { %v2620_v45 = vpop.eup %2619  ;;  %v1665_v46 = vpop.xlane.xlu1 %1664 }
0x16ca   :  { %v1672_v47 = vmul.f32 %v2620_v45, %v2616_v9  ;;  %2621 = vrcp.f32 %v1665_v46  ;;  %v2210_v9 = vld [vmem:[%s3165_s10 + $0x1] ss:$0 sm:$0xff] }
0x16cc   :  { %v1674_v48 = vpack.c.bf16 %v1672_v47, %v1672_v47 }
0x16cd   :  { %v1676_v49 = vpop.permute.xlu1 %1675 }
0x16ce   :  { %v1681_v50 = vsel %vm465_vm8, %v1676_v49, 0  ;;  %2488 = vmatmul.mubr.msk.bf16.vlgmr.msra.gmra.mrb[52].mxu1 %vm435_vm7, %v1674_v48  ;;  %v2571_v48 = vld [vmem:[%s3167_s14 + $0x20] sm:$0xff]   ;;  %v2572_v49 = vld [vmem:[%s3167_s14 + $0x28] sm:$0xff]  }
0x16cf   :  { %2480 = vmatpush3.bf16.msra.mxu0 %v1681_v50  ;;  %2503 = vmatprep.mubr.msk.bf16.mxu1 %vm2637_vm5, %v2636_v6  ;;  %v2573_v50 = vld [vmem:[%s3167_s14 + $0x30] sm:$0xff]  }
0x16d0   :  { %2491 = vmatprep.subr.bf16.mxu0 %v2636_v6 }
0x16d4   :  { %v2622_v51 = vpop.eup %2621 }
0x16d5   :  { %v1671_v53 = vmul.f32 %v2622_v51, %v2618_v41  ;;  %v2574_v51 = vld [vmem:[%s3167_s14 + $0x38] sm:$0xff]  }
0x16d7   :  { %v1673_v54 = vpack.c.bf16 %v1671_v53, %v1671_v53  ;;  %v2217_v53 = vld [vmem:[%s3168_s13 + $0x1] ss:$0 sm:$0xff] }
0x16d9   :  { %2482 = vmatmul.mubr.msk.bf16.vlgmr.msra.gmra.mrb[36].mxu0 %vm435_vm7, %v1673_v54 }
0x16da   :  { %2495 = vmatprep.mubr.msk.bf16.mxu0 %vm2637_vm5, %v2636_v6  ;;  %2492 = vmatpush3.bf16.msra.mxu0 %v2567_v55 }
0x16db   :  { %2493 = vmatprep.subr.bf16.mxu0 %v2636_v6 }
0x16de   :  { %2494 = vmatpush3.bf16.msra.mxu0 %v2568_v59 }
0x16df   :  { %2507 = vmatprep.subr.bf16.mxu0 %v2636_v6 }
0x17a1   :  { %v1765_v56 = vpop.f32.mrb[52].mxu1 }
0x17a2   :  { %v2489_v57 = vpop.f32.mrb[53].mxu1 }
0x17a3   :  { %v1768_v58 = vpop.f32.mrb[54].mxu1 }
0x17a4   :  { %v2490_v60 = vpop.f32.mrb[55].mxu1 }
0x17ac   :  { %v1717_v61 = vpop.f32.mrb[36].mxu0 }
0x17ad   :  { %v2546_v62 = vpack.i.bf16 %v1765_v56, %v1717_v61  ;;  %v2483_v63 = vpop.f32.mrb[37].mxu0 }
0x17ae   :  { %v1720_v0 = vpop.f32.mrb[38].mxu0 }
0x17af   :  { %v2484_v4 = vpop.f32.mrb[39].mxu0  ;;  %2547 = vrot.lane.b32.xlu1 %v2546_v62, %s2640_s25 }
0x1821   :  { %v2548_v5 = vpop.permute.xlu1 %2547 }
0x1822   :  { %v2550_v7 = vunpack.i.h.bf16 %v2548_v5  ;;  %v2549_v8 = vunpack.i.l.bf16 %v2548_v5 }
0x1824   :  { %v1780_v11 = vsel %vm325_vm6, %v3055_v22, %v2550_v7  ;;  %v1779_v12 = vsel %vm325_vm6, %v3034_v52, %v2549_v8 }
0x1825   :  { %v1781_v13 = vpack.c.bf16 %v1780_v11, %v1779_v12 }
0x1827   :  { %2496 = vmatmul.mubr.msk.bf16.vlgmr.msra.gmra.mrb[40].mxu0 %vm208_vm4, %v1781_v13 }
0x1828   :  { %2515 = vmatprep.mubr.msk.bf16.mxu0 %vm2637_vm5, %v2636_v6  ;;  %2508 = vmatpush3.bf16.msra.mxu0 %v2571_v48 }
0x1829   :  { %2509 = vmatprep.subr.bf16.mxu0 %v2636_v6 }
0x182c   :  { %2510 = vmatpush3.bf16.msra.mxu0 %v2572_v49 }
0x182d   :  { %2511 = vmatprep.subr.bf16.mxu0 %v2636_v6 }
0x1830   :  { %2512 = vmatpush3.bf16.msra.mxu0 %v2573_v50 }
0x1831   :  { %2513 = vmatprep.subr.bf16.mxu0 %v2636_v6 }
0x1834   :  { %2514 = vmatpush3.bf16.msra.mxu0 %v2574_v51 }
0x18fa   :  { %v1844_v15 = vpop.f32.mrb[40].mxu0 }
0x18fb   :  { %v1845_v16 = vadd.f32 %v2204_v14, %v1844_v15  ;;  %v2497_v18 = vpop.f32.mrb[41].mxu0 }
0x18fc   :  { %v1847_v19 = vpop.f32.mrb[42].mxu0 }
0x18fd   :  { %v1848_v20 = vadd.f32 %v2204_v14, %v1847_v19  ;;  %v2498_v21 = vpop.f32.mrb[43].mxu0  ;;  %v1851_v22 = vadd.f32 %v1845_v16, %v2981_v2 }
0x18fe   :  { %v2230_v21 = vld [vmem:[%s3169_s15 + $0x1] ss:$0 sm:$0xff] }
0x18ff   :  { %v1857_v52 = vsel %vm208_vm4, %v1851_v22, 0.0  ;;  %v1852_v23 = vadd.f32 %v1848_v20, %v2983_v3  ;;  %v2569_v3 = vld [vmem:[%s3164_s12 + $0x10] sm:$0xff]  }
0x1900   :  { %1858 = vadd.xlane.f32.xlu1 %v1857_v52  ;;  %2500 = vmatpush3.bf16.msra.mxu1 %v2569_v3 }
0x1901   :  { %v1860_v24 = vsel %vm208_vm4, %v1852_v23, 0.0  ;;  %2501 = vmatprep.subr.bf16.mxu1 %v2636_v6 }
0x1902   :  { %1861 = vadd.xlane.f32.xlu0 %v1860_v24 }
0x1904   :  { %2502 = vmatpush3.bf16.msra.mxu1 %v2570_v34 }
0x198d   :  { %v1859_v25 = vpop.xlane.xlu1 %1858 }
0x198e   :  { %v1863_v26 = vmul.f32 0.03125, %v1859_v25 }
0x198f   :  { %v1862_v27 = vpop.xlane.xlu0 %1861 }
0x1990   :  { %v1865_v17 = vsub.f32 %v1851_v22, %v1863_v26  ;;  %v1864_v1 = vmul.f32 0.03125, %v1862_v27 }
0x1992   :  { %v1866_v28 = vsub.f32 %v1852_v23, %v1864_v1  ;;  %v1867_v31 = vmul.f32 %v1865_v17, %v1865_v17 }
0x1994   :  { %v1869_v32 = vsel %vm208_vm4, %v1867_v31, 0.0  ;;  %v1868_v33 = vmul.f32 %v1866_v28, %v1866_v28 }
0x1995   :  { %1870 = vadd.xlane.f32.xlu0 %v1869_v32 }
0x1996   :  { %v1872_v2 = vsel %vm208_vm4, %v1868_v33, 0.0 }
0x1997   :  { %1873 = vadd.xlane.f32.xlu1 %v1872_v2 }
0x1a22   :  { %v1871_v35 = vpop.xlane.xlu0 %1870 }
0x1a23   :  { %v1875_v36 = vmul.f32 0.03125, %v1871_v35 }
0x1a24   :  { %v1874_v37 = vpop.xlane.xlu1 %1873 }
0x1a25   :  { %v1877_v38 = vadd.f32 1e-12, %v1875_v36  ;;  %v1876_v30 = vmul.f32 0.03125, %v1874_v37 }
0x1a27   :  { %2623 = vrsqrt.f32 %v1877_v38  ;;  %v1878_v39 = vadd.f32 1e-12, %v1876_v30 }
0x1a29   :  { %2625 = vrsqrt.f32 %v1878_v39 }
0x1a31   :  { %v2624_v40 = vpop.eup %2623 }
0x1a32   :  { %v1881_v10 = vmul.f32 %v2624_v40, %v1865_v17 }
0x1a33   :  { %v2626_v41 = vpop.eup %2625 }
0x1a34   :  { %v1889_v42 = vmul.f32 %v2210_v9, %v1881_v10  ;;  %v1882_v29 = vmul.f32 %v2626_v41, %v1866_v28 }
0x1a36   :  { %v1890_v44 = vmul.f32 %v2210_v9, %v1882_v29  ;;  %v1897_v45 = vadd.f32 %v2211_v43, %v1889_v42  ;;  %v2238_v29 = vld [vmem:[%s3170_s16 + $0x1] ss:$0 sm:$0xff] }
0x1a38   :  { %v1898_v46 = vadd.f32 %v2211_v43, %v1890_v44 }
0x1a3a   :  { %v1899_v47 = vpack.c.bf16 %v1898_v46, %v1897_v45 }
0x1a3c   :  { %2504 = vmatmul.mubr.msk.bf16.vlgmr.msra.gmra.mrb[56].mxu1 %vm208_vm4, %v1899_v47 }
0x1b0f   :  { %v1962_v54 = vpop.f32.mrb[56].mxu1 }
0x1b10   :  { %v1963_v55 = vadd.f32 %v2217_v53, %v1962_v54  ;;  %v2505_v56 = vpop.f32.mrb[57].mxu1 }
0x1b11   :  { %v1965_v57 = vpop.f32.mrb[58].mxu1 }
0x1b12   :  { %v1971_v58 = vmul.f32 0.044715, %v1963_v55  ;;  %v1966_v59 = vadd.f32 %v2217_v53, %v1965_v57  ;;  %v2506_v60 = vpop.f32.mrb[59].mxu1  ;;  %v1969_v14 = vmul.f32 0.5, %v1963_v55 }
0x1b14   :  { %v1973_v61 = vmul.f32 %v1971_v58, %v1963_v55  ;;  %v1972_v62 = vmul.f32 0.044715, %v1966_v59  ;;  %v1970_v15 = vmul.f32 0.5, %v1966_v59 }
0x1b16   :  { %v1975_v63 = vmul.f32 %v1973_v61, %v1963_v55  ;;  %v1974_v0 = vmul.f32 %v1972_v62, %v1966_v59 }
0x1b18   :  { %v1977_v4 = vadd.f32 %v1975_v63, %v1963_v55  ;;  %v1976_v5 = vmul.f32 %v1974_v0, %v1966_v59 }
0x1b1a   :  { %v1979_v7 = vmul.f32 0.7978846, %v1977_v4  ;;  %v1978_v6 = vadd.f32 %v1976_v5, %v1966_v59 }
0x1b1c   :  { %2627 = vtanh.f32 %v1979_v7  ;;  %v1980_v8 = vmul.f32 0.7978846, %v1978_v6 }
0x1b1e   :  { %2629 = vtanh.f32 %v1980_v8 }
0x1b26   :  { %v2628_v11 = vpop.eup %2627 }
0x1b27   :  { %v1983_v12 = vadd.f32 1.0, %v2628_v11 }
0x1b28   :  { %v2630_v13 = vpop.eup %2629 }
0x1b29   :  { %v1984_v16 = vadd.f32 1.0, %v2630_v13  ;;  %v1985_v18 = vmul.f32 %v1983_v12, %v1969_v14 }
0x1b2b   :  { %v1986_v19 = vmul.f32 %v1984_v16, %v1970_v15 }
0x1b2d   :  { %v1987_v20 = vpack.c.bf16 %v1986_v19, %v1985_v18 }
0x1b2f   :  { %2516 = vmatmul.mubr.msk.bf16.vlgmr.msra.gmra.mrb[44].mxu0 %vm117_vm1, %v1987_v20 }
0x1c02   :  { %v2066_v22 = vpop.f32.mrb[44].mxu0 }
0x1c03   :  { %v2067_v52 = vadd.f32 %v2230_v21, %v2066_v22  ;;  %v2517_v23 = vpop.f32.mrb[45].mxu0 }
0x1c04   :  { %v2069_v24 = vpop.f32.mrb[46].mxu0 }
0x1c05   :  { %v2070_v25 = vadd.f32 %v2230_v21, %v2069_v24  ;;  %v2518_v26 = vpop.f32.mrb[47].mxu0  ;;  %v2073_v27 = vadd.f32 %v2067_v52, %v1897_v45  ;;  %v2239_v45 = vld [vmem:[%s3171_s17 + $0x1] ss:$0 sm:$0xff] }
0x1c07   :  { %v2079_v17 = vsel %vm208_vm4, %v2073_v27, 0.0  ;;  %v2074_v1 = vadd.f32 %v2070_v25, %v1898_v46 }
0x1c08   :  { %2080 = vadd.xlane.f32.xlu0 %v2079_v17 }
0x1c09   :  { %v2082_v28 = vsel %vm208_vm4, %v2074_v1, 0.0 }
0x1c0a   :  { %2083 = vadd.xlane.f32.xlu1 %v2082_v28 }
0x1c95   :  { %v2081_v31 = vpop.xlane.xlu0 %2080 }
0x1c96   :  { %v2085_v32 = vmul.f32 0.03125, %v2081_v31 }
0x1c97   :  { %v2084_v33 = vpop.xlane.xlu1 %2083 }
0x1c98   :  { %v2087_v2 = vsub.f32 %v2073_v27, %v2085_v32  ;;  %v2086_v3 = vmul.f32 0.03125, %v2084_v33 }
0x1c9a   :  { %v2088_v34 = vsub.f32 %v2074_v1, %v2086_v3  ;;  %v2089_v35 = vmul.f32 %v2087_v2, %v2087_v2 }
0x1c9c   :  { %v2091_v36 = vsel %vm208_vm4, %v2089_v35, 0.0  ;;  %v2090_v37 = vmul.f32 %v2088_v34, %v2088_v34 }
0x1c9d   :  { %2092 = vadd.xlane.f32.xlu0 %v2091_v36 }
0x1c9e   :  { %v2094_v38 = vsel %vm208_vm4, %v2090_v37, 0.0 }
0x1c9f   :  { %2095 = vadd.xlane.f32.xlu1 %v2094_v38 }
0x1d2a   :  { %v2093_v30 = vpop.xlane.xlu0 %2092 }
0x1d2b   :  { %v2097_v39 = vmul.f32 0.03125, %v2093_v30 }
0x1d2c   :  { %v2096_v40 = vpop.xlane.xlu1 %2095 }
0x1d2d   :  { %v2099_v9 = vadd.f32 1e-12, %v2097_v39  ;;  %v2098_v10 = vmul.f32 0.03125, %v2096_v40 }
0x1d2f   :  { %2631 = vrsqrt.f32 %v2099_v9  ;;  %v2100_v41 = vadd.f32 1e-12, %v2098_v10 }
0x1d31   :  { %2633 = vrsqrt.f32 %v2100_v41 }
0x1d39   :  { %v2632_v42 = vpop.eup %2631 }
0x1d3a   :  { %v2103_v43 = vmul.f32 %v2632_v42, %v2087_v2 }
0x1d3b   :  { %v2634_v44 = vpop.eup %2633 }
0x1d3c   :  { %v2111_v46 = vmul.f32 %v2238_v29, %v2103_v43  ;;  %v2104_v47 = vmul.f32 %v2634_v44, %v2088_v34 }
0x1d3e   :  { %v2119_v48 = vadd.f32 %v2239_v45, %v2111_v46  ;;  %v2112_v49 = vmul.f32 %v2238_v29, %v2104_v47 }
0x1d40   :  { %2121 = vst.msk [vmem:[%s3172_s18] sm:$0xff] %vm208_vm4, %v2119_v48  ;;  %v2120_v50 = vadd.f32 %v2239_v45, %v2112_v49 }
0x1d42   :  { %2122 = vst.msk [vmem:[%s3172_s18 + $0x8] sm:$0xff] %vm208_vm4, %v2120_v50 }

</bundles_post_ra>
